<compile_context>
chip_gen: v7x
topology: tpu7x:2x2x1
jax: 0.10.0
libtpu: 0.0.40
codegen_flags: <defaults>
</compile_context>

<pallas_src>
import functools

import jax
import jax.numpy as jnp
from jax.experimental import pallas as pl
from jax.experimental.pallas import tpu as pltpu


DIM_H = 256            # hidden width of encoder/decoder MLPs (matches module)
TILE_B_DEFAULT = 512   # batch tile (MXU M dim); multiple of 128
LAT_PAD = 128          # lane padding of each (mean / log_var) head


def _round_up(x, m):
    return (x + m - 1) // m * m


def _bf16_eup_supported():
    """bf16 transcendental path exists on v6e/v7x; not on v5e and older."""
    try:
        kind = jax.devices()[0].device_kind.lower()
    except Exception:
        return False
    return not any(t in kind for t in ("v2", "v3", "v4", "v5"))


def _vae_kernel(x_ref, eps_ref,
                w1e_ref, b1e_ref, w2e_ref, b2e_ref,
                wmv_ref, bmv_ref,
                w1d_ref, b1d_ref, w2d_ref, b2d_ref,
                out_ref, *, n_samples, dim_latent, tile_b, batch_size,
                reduce, use_bf16_eup):
    f32 = jnp.float32
    bf16 = jnp.bfloat16
    N = n_samples
    L = dim_latent
    tb = tile_b

    x_bf = x_ref[...]                                 # (tb, D) bf16: MXU LHS
    x_f32 = x_bf.astype(f32)                          # BCE target (f32 math)

    # ---- encoder MLP: D -> 256 -> 256, relu/relu (bf16 matmul, f32 accum) ----
    h = jnp.dot(x_bf, w1e_ref[...], preferred_element_type=f32) + b1e_ref[...]
    h = jnp.maximum(h, 0.0)
    h = jnp.dot(h.astype(bf16), w2e_ref[...], preferred_element_type=f32) + b2e_ref[...]
    h = jnp.maximum(h, 0.0)                           # (tb, 256) f32

    # ---- fused heads, lane-padded: mean @ lanes [0,128), log_var @ [128,256) ----
    stats = jnp.dot(h.astype(bf16), wmv_ref[...], preferred_element_type=f32) + bmv_ref[...]
    mean = stats[:, :L]                               # (tb, L), lane-aligned view
    log_var = stats[:, LAT_PAD:LAT_PAD + L]           # (tb, L), lane-aligned view
    dev = jnp.exp(0.5 * log_var)
    var = dev * dev                                   # = exp(log_var), no 2nd exp

    # ---- KL(q(z|x) || N(0,I)) summed over latent dim -> (tb, 1) ----
    kl = 0.5 * jnp.sum(var + mean * mean - 1.0 - log_var, axis=-1, keepdims=True)

    # ---- decoder: stack the N samples along M, one dec1 + one dec2 matmul ----
    z = jnp.concatenate([mean + dev * eps_ref[n] for n in range(N)],
                        axis=0).astype(bf16)          # (N*tb, L)
    hd = jnp.dot(z, w1d_ref[...], preferred_element_type=f32) + b1d_ref[...]
    hd = jnp.maximum(hd, 0.0)                         # (N*tb, 256)
    logits = jnp.dot(hd.astype(bf16), w2d_ref[...], preferred_element_type=f32) + b2d_ref[...]

    # softplus(logits) = max(l,0) + log(1 + exp(-|l|)); the max term dominates
    # whenever exp(-|l|) underflows, so log(1+t) is numerically adequate here.
    neg_abs = -jnp.abs(logits)
    if use_bf16_eup:
        tail = jnp.log(1.0 + jnp.exp(neg_abs.astype(bf16))).astype(f32)
    else:
        tail = jnp.log(1.0 + jnp.exp(neg_abs))
    sp = jnp.maximum(logits, 0.0) + tail              # (N*tb, D) f32

    # per-(row, sample) -elbo = BCE + KL, using sublane-aligned static slices
    cols = []
    for n in range(N):
        sl = slice(n * tb, (n + 1) * tb)
        bce = jnp.sum(sp[sl] - x_f32 * logits[sl], axis=-1, keepdims=True)  # (tb,1)
        cols.append(bce + kl)

    if reduce:
        # Fast path: masked per-tile partial sum, no transpose epilogue.
        row = jax.lax.broadcasted_iota(jnp.int32, (tb, 1), 0)
        valid = (pl.program_id(0) * tb + row) < batch_size
        acc = jnp.zeros((tb, 1), f32)
        for col in cols:
            acc = acc + jnp.where(valid, col, 0.0)
        total = jnp.sum(acc, axis=0, keepdims=True)   # (1, 1)
        out_ref[0] = jnp.broadcast_to(total, (8, 128))
    else:
        # Lane-dense (N, tb) output: scatter the per-sample columns into the
        # first N lanes of an (8,128)-aligned matrix and transpose.
        lane = jax.lax.broadcasted_iota(jnp.int32, (tb, 128), 1)
        mat = jnp.zeros((tb, 128), f32)
        for n, col in enumerate(cols):
            mat = mat + jnp.where(lane == n, col, 0.0)
        out_ref[...] = jnp.transpose(mat)[:N, :]      # (N, tb)


def vae_forward(x, eps, params, reduce=True, tile_b=TILE_B_DEFAULT):
    """Equivalent of VAE.forward(x, n_samples=N, reduce=reduce).

    x:      (B, C, H, W) with targets in [0, 1]; flattened like x.view(B, -1).
    eps:    (B, N, L) standard-normal noise (analog of torch.randn(B, N, L)).
    params: tuple from init_vae_params (PyTorch Linear layout, weights (in, out)).
    Returns scalar -elbo.mean() if reduce else (B, N) per-sample -elbo.
    """
    w1e, b1e, w2e, b2e, wm, bm, wv, bv, w1d, b1d, w2d, b2d = params
    B = x.shape[0]
    D = 1
    for s in x.shape[1:]:
        D *= s
    N, L = eps.shape[1], eps.shape[2]
    assert 1 <= N <= 128 and L <= LAT_PAD

    f32 = jnp.float32
    bf = jnp.bfloat16

    # bf16 x: it is both the MXU LHS and the BCE target (halves x's HBM traffic).
    x_flat = x.reshape(B, D).astype(bf)
    eps_t = jnp.transpose(eps, (1, 0, 2)).astype(f32)            # (N, B, L)

    # Fused, lane-padded mean/log_var heads: mean -> lanes [0,128), log_var -> [128,256).
    dim_h = wm.shape[0]
    wmv = jnp.zeros((dim_h, 2 * LAT_PAD), f32)
    wmv = wmv.at[:, :L].set(wm).at[:, LAT_PAD:LAT_PAD + L].set(wv)
    bmv = jnp.zeros((1, 2 * LAT_PAD), f32)
    bmv = bmv.at[:, :L].set(bm).at[:, LAT_PAD:LAT_PAD + L].set(bv)

    # bf16 weights for the MXU; biases and all elementwise math stay f32.
    w1e_b, w2e_b, wmv_b, w1d_b, w2d_b = (a.astype(bf) for a in (w1e, w2e, wmv, w1d, w2d))

    # Batch tiling: for B > 128 always emit >= 2 tiles (128-aligned) so both
    # v7x TensorCores are used; small batches run as one sublane-aligned tile.
    if B > 128:
        assert tile_b % 128 == 0 and tile_b >= 128
        tb = min(tile_b, _round_up(-(-B // 2), 128))
    else:
        tb = _round_up(B, 8)
    Bp = _round_up(B, tb)
    if Bp != B:
        x_flat = jnp.pad(x_flat, ((0, Bp - B), (0, 0)))
        eps_t = jnp.pad(eps_t, ((0, 0), (0, Bp - B), (0, 0)))
    num_tiles = Bp // tb
    grid = (num_tiles,)

    const2 = lambda i: (0, 0)
    kernel = functools.partial(
        _vae_kernel, n_samples=N, dim_latent=L, tile_b=tb, batch_size=B,
        reduce=reduce, use_bf16_eup=_bf16_eup_supported())

    if reduce:
        out_shape = jax.ShapeDtypeStruct((num_tiles, 8, 128), f32)
        out_specs = pl.BlockSpec((1, 8, 128), lambda i: (i, 0, 0))
    else:
        out_shape = jax.ShapeDtypeStruct((N, Bp), f32)
        out_specs = pl.BlockSpec((N, tb), lambda i: (0, i))

    out = pl.pallas_call(
        kernel,
        out_shape=out_shape,
        grid=grid,
        in_specs=[
            pl.BlockSpec((tb, D), lambda i: (i, 0)),          # x tile (bf16)
            pl.BlockSpec((N, tb, L), lambda i: (0, i, 0)),    # eps tile
            pl.BlockSpec(w1e_b.shape, const2),                # weights/biases stay
            pl.BlockSpec(b1e.shape, const2),                  # VMEM-resident
            pl.BlockSpec(w2e_b.shape, const2),
            pl.BlockSpec(b2e.shape, const2),
            pl.BlockSpec(wmv_b.shape, const2),
            pl.BlockSpec(bmv.shape, const2),
            pl.BlockSpec(w1d_b.shape, const2),
            pl.BlockSpec(b1d.shape, const2),
            pl.BlockSpec(w2d_b.shape, const2),
            pl.BlockSpec(b2d.shape, const2),
        ],
        out_specs=out_specs,
        compiler_params=pltpu.CompilerParams(
            dimension_semantics=("parallel",),
            vmem_limit_bytes=40 * 1024 * 1024,   # sized for tb=512; < v7x ceiling
        ),
    )(x_flat, eps_t, w1e_b, b1e, w2e_b, b2e, wmv_b, bmv, w1d_b, b1d, w2d_b, b2d)

    if reduce:
        return jnp.sum(out[:, 0, 0]) / (B * N)           # == (-elbo).mean()
    return jnp.transpose(out[:, :B])                     # (B, N) per-sample -elbo


def _vae_reference(x, eps, params):
    """Pure-JAX f32 reference of -elbo per (row, sample); same softplus BCE."""
    w1e, b1e, w2e, b2e, wm, bm, wv, bv, w1d, b1d, w2d, b2d = params
    B = x.shape[0]
    xf = x.reshape(B, -1).astype(jnp.float32)
    h = jax.nn.relu(xf @ w1e + b1e)
    h = jax.nn.relu(h @ w2e + b2e)
    mean = h @ wm + bm
    log_var = h @ wv + bv
    dev = jnp.exp(0.5 * log_var)
    z = mean[:, None, :] + dev[:, None, :] * eps                 # (B, N, L)
    hd = jax.nn.relu(z @ w1d + b1d)
    logits = hd @ w2d + b2d                                      # (B, N, D)
    sp = jnp.maximum(logits, 0.0) + jnp.log(1.0 + jnp.exp(-jnp.abs(logits)))
    bce = jnp.sum(sp - xf[:, None, :] * logits, axis=-1)         # (B, N)
    kl = 0.5 * jnp.sum(jnp.exp(log_var) + mean ** 2 - 1.0 - log_var, axis=-1)
    return bce + kl[:, None]


def _init_linear(key, fan_in, fan_out):
    """Deterministic PyTorch-style uniform init; weight stored as (in, out)."""
    kw, kb = jax.random.split(key)
    bound = 1.0 / float(fan_in) ** 0.5
    w = jax.random.uniform(kw, (fan_in, fan_out), jnp.float32, -bound, bound)
    b = jax.random.uniform(kb, (1, fan_out), jnp.float32, -bound, bound)
    return w, b


def init_vae_params(key, dim_in, dim_latent, dim_h=DIM_H):
    keys = jax.random.split(key, 6)
    w1e, b1e = _init_linear(keys[0], dim_in, dim_h)       # encoder.fc1
    w2e, b2e = _init_linear(keys[1], dim_h, dim_h)        # encoder.fc2
    wm, bm = _init_linear(keys[2], dim_h, dim_latent)     # gaussian.mean_layer
    wv, bv = _init_linear(keys[3], dim_h, dim_latent)     # gaussian.log_var_layer
    w1d, b1d = _init_linear(keys[4], dim_latent, dim_h)   # decoder.fc1
    w2d, b2d = _init_linear(keys[5], dim_h, dim_in)       # decoder.fc2
    return (w1e, b1e, w2e, b2e, wm, bm, wv, bv, w1d, b1d, w2d, b2d)


if __name__ == "__main__":
    # MNIST-like small shapes: B=8, C=1, H=W=28 -> dim_in=784, latent=32, N=2.
    B, H, W = 8, 28, 28
    dim_in = 1 * H * W
    dim_latent = 32
    n_samples = 2

    key = jax.random.PRNGKey(0)
    k_x, k_eps, k_params, k_x2, k_eps2 = jax.random.split(key, 5)

    x = jax.random.uniform(k_x, (B, 1, H, W), jnp.float32, 0.0, 1.0)  # BCE targets in [0,1]
    eps = jax.random.normal(k_eps, (B, n_samples, dim_latent), jnp.float32)
    params = init_vae_params(k_params, dim_in, dim_latent)

    # TODO(synk): logger.update(...) calls and the extra `gen = decoder(randn(1, L))`
    # sample exist only for logging side-effects and are intentionally omitted.

    fwd = jax.jit(vae_forward, static_argnames=("reduce", "tile_b"))

    # Scalar training loss (reduce=True): in-kernel masked partial-sum path.
    loss = fwd(x, eps, params)
    jax.block_until_ready(loss)
    assert loss.shape == () and bool(jnp.isfinite(loss))

    # Per-sample -ELBO (reduce=False), shape (B, N); consistent with the mean.
    per_sample = fwd(x, eps, params, reduce=False)
    jax.block_until_ready(per_sample)
    assert per_sample.shape == (B, n_samples)
    assert bool(jnp.all(jnp.isfinite(per_sample)))
    assert bool(jnp.allclose(loss, jnp.mean(per_sample), rtol=1e-4, atol=1e-3))

    # f32 reference check (bf16 matmuls / bf16 EUP => loose tolerance).
    ref_ps = _vae_reference(x, eps, params)
    assert bool(jnp.allclose(per_sample, ref_ps, rtol=2e-2, atol=2.0))
    assert bool(jnp.allclose(loss, jnp.mean(ref_ps), rtol=2e-2, atol=1.0))

    # Exercise the multi-tile grid (>= 2 tiles for megacore) + tail-padding path.
    B2 = 200
    x2 = jax.random.uniform(k_x2, (B2, 1, H, W), jnp.float32, 0.0, 1.0)
    eps2 = jax.random.normal(k_eps2, (B2, n_samples, dim_latent), jnp.float32)
    loss2 = fwd(x2, eps2, params)
    ps2 = fwd(x2, eps2, params, reduce=False)
    jax.block_until_ready((loss2, ps2))
    assert loss2.shape == () and bool(jnp.isfinite(loss2))
    assert ps2.shape == (B2, n_samples)
    assert bool(jnp.allclose(loss2, jnp.mean(ps2), rtol=1e-4, atol=1e-3))
    ref2 = _vae_reference(x2, eps2, params)
    assert bool(jnp.allclose(loss2, jnp.mean(ref2), rtol=2e-2, atol=1.0))

    # Same shapes with an explicitly smaller tile (still >= 2 grid steps).
    loss3 = fwd(x2, eps2, params, tile_b=128)
    jax.block_until_ready(loss3)
    assert bool(jnp.allclose(loss2, loss3, rtol=1e-4, atol=1e-3))

    print("KERNEL_OK")
</pallas_src>

<mosaic_0001>
module attributes {stable_mosaic.version = 11 : i64} {
  func.func @_vae_kernel(%arg0: i32, %arg1: memref<8x784xbf16, #tpu.memory_space<vmem>>, %arg2: memref<2x8x32xf32, #tpu.memory_space<vmem>>, %arg3: memref<784x256xbf16, #tpu.memory_space<vmem>>, %arg4: memref<1x256xf32, #tpu.memory_space<vmem>>, %arg5: memref<256x256xbf16, #tpu.memory_space<vmem>>, %arg6: memref<1x256xf32, #tpu.memory_space<vmem>>, %arg7: memref<256x256xbf16, #tpu.memory_space<vmem>>, %arg8: memref<1x256xf32, #tpu.memory_space<vmem>>, %arg9: memref<32x256xbf16, #tpu.memory_space<vmem>>, %arg10: memref<1x256xf32, #tpu.memory_space<vmem>>, %arg11: memref<256x784xbf16, #tpu.memory_space<vmem>>, %arg12: memref<1x784xf32, #tpu.memory_space<vmem>>, %arg13: memref<1x8x128xf32, #tpu.memory_space<vmem>>) attributes {dimension_semantics = [#tpu.dimension_semantics<parallel>], iteration_bounds = array<i64: 1>, scalar_prefetch = 0 : i64, scratch_operands = 0 : i64, tpu.core_type = #tpu.core_type<tc>, window_params = [{transform_indices = @transform_0, window_bounds = array<i64: 8, 784>}, {transform_indices = @transform_1, window_bounds = array<i64: 2, 8, 32>}, {pipeline_mode = #tpu.pipeline_mode<synchronous>, transform_indices = @transform_2, window_bounds = array<i64: 784, 256>}, {pipeline_mode = #tpu.pipeline_mode<synchronous>, transform_indices = @transform_3, window_bounds = array<i64: 1, 256>}, {pipeline_mode = #tpu.pipeline_mode<synchronous>, transform_indices = @transform_4, window_bounds = array<i64: 256, 256>}, {pipeline_mode = #tpu.pipeline_mode<synchronous>, transform_indices = @transform_5, window_bounds = array<i64: 1, 256>}, {pipeline_mode = #tpu.pipeline_mode<synchronous>, transform_indices = @transform_6, window_bounds = array<i64: 256, 256>}, {pipeline_mode = #tpu.pipeline_mode<synchronous>, transform_indices = @transform_7, window_bounds = array<i64: 1, 256>}, {pipeline_mode = #tpu.pipeline_mode<synchronous>, transform_indices = @transform_8, window_bounds = array<i64: 32, 256>}, {pipeline_mode = #tpu.pipeline_mode<synchronous>, transform_indices = @transform_9, window_bounds = array<i64: 1, 256>}, {pipeline_mode = #tpu.pipeline_mode<synchronous>, transform_indices = @transform_10, window_bounds = array<i64: 256, 784>}, {pipeline_mode = #tpu.pipeline_mode<synchronous>, transform_indices = @transform_11, window_bounds = array<i64: 1, 784>}, {transform_indices = @transform_12, window_bounds = array<i64: 1, 8, 128>}]} {
    %c0 = arith.constant 0 : index
    %c0_0 = arith.constant 0 : index
    %0 = vector.load %arg1[%c0, %c0_0] : memref<8x784xbf16, #tpu.memory_space<vmem>>, vector<8x784xbf16>
    %1 = arith.extf %0 : vector<8x784xbf16> to vector<8x784xf32>
    %c0_1 = arith.constant 0 : index
    %c0_2 = arith.constant 0 : index
    %2 = vector.load %arg3[%c0_1, %c0_2] : memref<784x256xbf16, #tpu.memory_space<vmem>>, vector<784x256xbf16>
    %cst = arith.constant dense<0.000000e+00> : vector<8x256xf32>
    %3 = tpu.matmul %0, %2, %cst {dimension_numbers = #tpu.dot_dimension_numbers<[1], [0], [0], [1], [0, 0, 1, 1], [], []>} : vector<8x784xbf16>, vector<784x256xbf16>, vector<8x256xf32> -> vector<8x256xf32>
    %c0_3 = arith.constant 0 : index
    %c0_4 = arith.constant 0 : index
    %4 = vector.load %arg4[%c0_3, %c0_4] : memref<1x256xf32, #tpu.memory_space<vmem>>, vector<1x256xf32>
    %5 = vector.broadcast %4 : vector<1x256xf32> to vector<8x256xf32>
    %6 = arith.addf %3, %5 : vector<8x256xf32>
    %cst_5 = arith.constant 0.000000e+00 : f32
    %7 = vector.broadcast %cst_5 : f32 to vector<8x256xf32>
    %8 = arith.maximumf %6, %7 : vector<8x256xf32>
    %9 = arith.truncf %8 : vector<8x256xf32> to vector<8x256xbf16>
    %c0_6 = arith.constant 0 : index
    %c0_7 = arith.constant 0 : index
    %10 = vector.load %arg5[%c0_6, %c0_7] : memref<256x256xbf16, #tpu.memory_space<vmem>>, vector<256x256xbf16>
    %cst_8 = arith.constant dense<0.000000e+00> : vector<8x256xf32>
    %11 = tpu.matmul %9, %10, %cst_8 {dimension_numbers = #tpu.dot_dimension_numbers<[1], [0], [0], [1], [0, 0, 1, 1], [], []>} : vector<8x256xbf16>, vector<256x256xbf16>, vector<8x256xf32> -> vector<8x256xf32>
    %c0_9 = arith.constant 0 : index
    %c0_10 = arith.constant 0 : index
    %12 = vector.load %arg6[%c0_9, %c0_10] : memref<1x256xf32, #tpu.memory_space<vmem>>, vector<1x256xf32>
    %13 = vector.broadcast %12 : vector<1x256xf32> to vector<8x256xf32>
    %14 = arith.addf %11, %13 : vector<8x256xf32>
    %cst_11 = arith.constant 0.000000e+00 : f32
    %15 = vector.broadcast %cst_11 : f32 to vector<8x256xf32>
    %16 = arith.maximumf %14, %15 : vector<8x256xf32>
    %17 = arith.truncf %16 : vector<8x256xf32> to vector<8x256xbf16>
    %c0_12 = arith.constant 0 : index
    %c0_13 = arith.constant 0 : index
    %18 = vector.load %arg7[%c0_12, %c0_13] : memref<256x256xbf16, #tpu.memory_space<vmem>>, vector<256x256xbf16>
    %cst_14 = arith.constant dense<0.000000e+00> : vector<8x256xf32>
    %19 = tpu.matmul %17, %18, %cst_14 {dimension_numbers = #tpu.dot_dimension_numbers<[1], [0], [0], [1], [0, 0, 1, 1], [], []>} : vector<8x256xbf16>, vector<256x256xbf16>, vector<8x256xf32> -> vector<8x256xf32>
    %c0_15 = arith.constant 0 : index
    %c0_16 = arith.constant 0 : index
    %20 = vector.load %arg8[%c0_15, %c0_16] : memref<1x256xf32, #tpu.memory_space<vmem>>, vector<1x256xf32>
    %21 = vector.broadcast %20 : vector<1x256xf32> to vector<8x256xf32>
    %22 = arith.addf %19, %21 : vector<8x256xf32>
    %23 = vector.extract_strided_slice %22 {offsets = [0, 0], sizes = [8, 32], strides = [1, 1]} : vector<8x256xf32> to vector<8x32xf32>
    %24 = vector.extract_strided_slice %22 {offsets = [0, 128], sizes = [8, 32], strides = [1, 1]} : vector<8x256xf32> to vector<8x32xf32>
    %cst_17 = arith.constant 5.000000e-01 : f32
    %25 = vector.broadcast %cst_17 : f32 to vector<8x32xf32>
    %26 = arith.mulf %25, %24 : vector<8x32xf32>
    %27 = math.exp %26 : vector<8x32xf32>
    %28 = arith.mulf %27, %27 : vector<8x32xf32>
    %29 = arith.mulf %23, %23 : vector<8x32xf32>
    %30 = arith.addf %28, %29 : vector<8x32xf32>
    %cst_18 = arith.constant 1.000000e+00 : f32
    %31 = vector.broadcast %cst_18 : f32 to vector<8x32xf32>
    %32 = arith.subf %30, %31 : vector<8x32xf32>
    %33 = arith.subf %32, %24 : vector<8x32xf32>
    %cst_19 = arith.constant dense<0.000000e+00> : vector<8xf32>
    %34 = vector.multi_reduction <add>, %33, %cst_19 [1] : vector<8x32xf32> to vector<8xf32>
    %35 = vector.shape_cast %34 : vector<8xf32> to vector<8x1xf32>
    %cst_20 = arith.constant 5.000000e-01 : f32
    %36 = vector.broadcast %cst_20 : f32 to vector<8x1xf32>
    %37 = arith.mulf %36, %35 : vector<8x1xf32>
    %c0_21 = arith.constant 0 : index
    %c0_22 = arith.constant 0 : index
    %c0_23 = arith.constant 0 : index
    %38 = vector.load %arg2[%c0_21, %c0_22, %c0_23] : memref<2x8x32xf32, #tpu.memory_space<vmem>>, vector<1x8x32xf32>
    %39 = vector.shape_cast %38 : vector<1x8x32xf32> to vector<8x32xf32>
    %40 = arith.mulf %27, %39 : vector<8x32xf32>
    %41 = arith.addf %23, %40 : vector<8x32xf32>
    %c1 = arith.constant 1 : index
    %c0_24 = arith.constant 0 : index
    %c0_25 = arith.constant 0 : index
    %42 = vector.load %arg2[%c1, %c0_24, %c0_25] : memref<2x8x32xf32, #tpu.memory_space<vmem>>, vector<1x8x32xf32>
    %43 = vector.shape_cast %42 : vector<1x8x32xf32> to vector<8x32xf32>
    %44 = arith.mulf %27, %43 : vector<8x32xf32>
    %45 = arith.addf %23, %44 : vector<8x32xf32>
    %46 = tpu.concatenate %41, %45 in 0 : vector<8x32xf32>, vector<8x32xf32> -> vector<16x32xf32>
    %47 = arith.truncf %46 : vector<16x32xf32> to vector<16x32xbf16>
    %c0_26 = arith.constant 0 : index
    %c0_27 = arith.constant 0 : index
    %48 = vector.load %arg9[%c0_26, %c0_27] : memref<32x256xbf16, #tpu.memory_space<vmem>>, vector<32x256xbf16>
    %cst_28 = arith.constant dense<0.000000e+00> : vector<16x256xf32>
    %49 = tpu.matmul %47, %48, %cst_28 {dimension_numbers = #tpu.dot_dimension_numbers<[1], [0], [0], [1], [0, 0, 1, 1], [], []>} : vector<16x32xbf16>, vector<32x256xbf16>, vector<16x256xf32> -> vector<16x256xf32>
    %c0_29 = arith.constant 0 : index
    %c0_30 = arith.constant 0 : index
    %50 = vector.load %arg10[%c0_29, %c0_30] : memref<1x256xf32, #tpu.memory_space<vmem>>, vector<1x256xf32>
    %51 = vector.broadcast %50 : vector<1x256xf32> to vector<16x256xf32>
    %52 = arith.addf %49, %51 : vector<16x256xf32>
    %cst_31 = arith.constant 0.000000e+00 : f32
    %53 = vector.broadcast %cst_31 : f32 to vector<16x256xf32>
    %54 = arith.maximumf %52, %53 : vector<16x256xf32>
    %55 = arith.truncf %54 : vector<16x256xf32> to vector<16x256xbf16>
    %c0_32 = arith.constant 0 : index
    %c0_33 = arith.constant 0 : index
    %56 = vector.load %arg11[%c0_32, %c0_33] : memref<256x784xbf16, #tpu.memory_space<vmem>>, vector<256x784xbf16>
    %cst_34 = arith.constant dense<0.000000e+00> : vector<16x784xf32>
    %57 = tpu.matmul %55, %56, %cst_34 {dimension_numbers = #tpu.dot_dimension_numbers<[1], [0], [0], [1], [0, 0, 1, 1], [], []>} : vector<16x256xbf16>, vector<256x784xbf16>, vector<16x784xf32> -> vector<16x784xf32>
    %c0_35 = arith.constant 0 : index
    %c0_36 = arith.constant 0 : index
    %58 = vector.load %arg12[%c0_35, %c0_36] : memref<1x784xf32, #tpu.memory_space<vmem>>, vector<1x784xf32>
    %59 = vector.broadcast %58 : vector<1x784xf32> to vector<16x784xf32>
    %60 = arith.addf %57, %59 : vector<16x784xf32>
    %61 = math.absf %60 : vector<16x784xf32>
    %cst_37 = arith.constant 0.000000e+00 : f32
    %62 = vector.broadcast %cst_37 : f32 to vector<16x784xf32>
    %63 = arith.subf %62, %61 : vector<16x784xf32>
    %64 = arith.truncf %63 : vector<16x784xf32> to vector<16x784xbf16>
    %65 = math.exp %64 : vector<16x784xbf16>
    %cst_38 = arith.constant 1.000000e+00 : bf16
    %66 = vector.broadcast %cst_38 : bf16 to vector<16x784xbf16>
    %67 = arith.addf %66, %65 : vector<16x784xbf16>
    %68 = math.log %67 : vector<16x784xbf16>
    %69 = arith.extf %68 : vector<16x784xbf16> to vector<16x784xf32>
    %cst_39 = arith.constant 0.000000e+00 : f32
    %70 = vector.broadcast %cst_39 : f32 to vector<16x784xf32>
    %71 = arith.maximumf %60, %70 : vector<16x784xf32>
    %72 = arith.addf %71, %69 : vector<16x784xf32>
    %73 = vector.extract_strided_slice %72 {offsets = [0, 0], sizes = [8, 784], strides = [1, 1]} : vector<16x784xf32> to vector<8x784xf32>
    %74 = vector.extract_strided_slice %60 {offsets = [0, 0], sizes = [8, 784], strides = [1, 1]} : vector<16x784xf32> to vector<8x784xf32>
    %75 = arith.mulf %1, %74 : vector<8x784xf32>
    %76 = arith.subf %73, %75 : vector<8x784xf32>
    %cst_40 = arith.constant dense<0.000000e+00> : vector<8xf32>
    %77 = vector.multi_reduction <add>, %76, %cst_40 [1] : vector<8x784xf32> to vector<8xf32>
    %78 = vector.shape_cast %77 : vector<8xf32> to vector<8x1xf32>
    %79 = arith.addf %78, %37 : vector<8x1xf32>
    %80 = vector.extract_strided_slice %72 {offsets = [8, 0], sizes = [8, 784], strides = [1, 1]} : vector<16x784xf32> to vector<8x784xf32>
    %81 = vector.extract_strided_slice %60 {offsets = [8, 0], sizes = [8, 784], strides = [1, 1]} : vector<16x784xf32> to vector<8x784xf32>
    %82 = arith.mulf %1, %81 : vector<8x784xf32>
    %83 = arith.subf %80, %82 : vector<8x784xf32>
    %cst_41 = arith.constant dense<0.000000e+00> : vector<8xf32>
    %84 = vector.multi_reduction <add>, %83, %cst_41 [1] : vector<8x784xf32> to vector<8xf32>
    %85 = vector.shape_cast %84 : vector<8xf32> to vector<8x1xf32>
    %86 = arith.addf %85, %37 : vector<8x1xf32>
    %87 = tpu.iota {dimensions = array<i32: 0>} : vector<8x1xi32>
    %c8_i32 = arith.constant 8 : i32
    %88 = arith.muli %arg0, %c8_i32 : i32
    %89 = vector.broadcast %88 : i32 to vector<8x1xi32>
    %90 = arith.addi %89, %87 : vector<8x1xi32>
    %c8_i32_42 = arith.constant 8 : i32
    %91 = vector.broadcast %c8_i32_42 : i32 to vector<8x1xi32>
    %92 = arith.cmpi slt, %90, %91 : vector<8x1xi32>
    %cst_43 = arith.constant 0.000000e+00 : f32
    %93 = vector.broadcast %cst_43 : f32 to vector<8x1xf32>
    %cst_44 = arith.constant 0.000000e+00 : f32
    %94 = vector.broadcast %cst_44 : f32 to vector<8x1xf32>
    %95 = arith.select %92, %79, %94 : vector<8x1xi1>, vector<8x1xf32>
    %96 = arith.addf %93, %95 : vector<8x1xf32>
    %cst_45 = arith.constant 0.000000e+00 : f32
    %97 = vector.broadcast %cst_45 : f32 to vector<8x1xf32>
    %98 = arith.select %92, %86, %97 : vector<8x1xi1>, vector<8x1xf32>
    %99 = arith.addf %96, %98 : vector<8x1xf32>
    %cst_46 = arith.constant dense<0.000000e+00> : vector<1xf32>
    %100 = vector.multi_reduction <add>, %99, %cst_46 [0] : vector<8x1xf32> to vector<1xf32>
    %101 = vector.shape_cast %100 : vector<1xf32> to vector<1x1xf32>
    %102 = vector.shape_cast %101 : vector<1x1xf32> to vector<1x1xf32>
    %103 = vector.broadcast %102 : vector<1x1xf32> to vector<8x128xf32>
    %c0_47 = arith.constant 0 : index
    %c0_48 = arith.constant 0 : index
    %c0_49 = arith.constant 0 : index
    %104 = vector.load %arg13[%c0_47, %c0_48, %c0_49] : memref<1x8x128xf32, #tpu.memory_space<vmem>>, vector<1x8x128xf32>
    %105 = vector.shape_cast %104 : vector<1x8x128xf32> to vector<8x128xf32>
    %106 = vector.shape_cast %103 : vector<8x128xf32> to vector<1x8x128xf32>
    tpu.vector_store %arg13[%c0_47, %c0_48, %c0_49], %106 {strides = array<i32>} : memref<1x8x128xf32, #tpu.memory_space<vmem>>, vector<1x8x128xf32>,
    return
  }
  func.func @transform_0(%arg0: i32) -> (i32, i32) {
    %c0_i32 = arith.constant 0 : i32
    %c0_i32_0 = arith.constant 0 : i32
    return %arg0, %c0_i32 : i32, i32
  }
  func.func @transform_1(%arg0: i32) -> (i32, i32, i32) {
    %c0_i32 = arith.constant 0 : i32
    %c0_i32_0 = arith.constant 0 : i32
    %c0_i32_1 = arith.constant 0 : i32
    return %c0_i32, %arg0, %c0_i32_0 : i32, i32, i32
  }
  func.func @transform_2(%arg0: i32) -> (i32, i32) {
    %c0_i32 = arith.constant 0 : i32
    %c0_i32_0 = arith.constant 0 : i32
    %c0_i32_1 = arith.constant 0 : i32
    return %c0_i32, %c0_i32_0 : i32, i32
  }
  func.func @transform_3(%arg0: i32) -> (i32, i32) {
    %c0_i32 = arith.constant 0 : i32
    %c0_i32_0 = arith.constant 0 : i32
    %c0_i32_1 = arith.constant 0 : i32
    return %c0_i32, %c0_i32_0 : i32, i32
  }
  func.func @transform_4(%arg0: i32) -> (i32, i32) {
    %c0_i32 = arith.constant 0 : i32
    %c0_i32_0 = arith.constant 0 : i32
    %c0_i32_1 = arith.constant 0 : i32
    return %c0_i32, %c0_i32_0 : i32, i32
  }
  func.func @transform_5(%arg0: i32) -> (i32, i32) {
    %c0_i32 = arith.constant 0 : i32
    %c0_i32_0 = arith.constant 0 : i32
    %c0_i32_1 = arith.constant 0 : i32
    return %c0_i32, %c0_i32_0 : i32, i32
  }
  func.func @transform_6(%arg0: i32) -> (i32, i32) {
    %c0_i32 = arith.constant 0 : i32
    %c0_i32_0 = arith.constant 0 : i32
    %c0_i32_1 = arith.constant 0 : i32
    return %c0_i32, %c0_i32_0 : i32, i32
  }
  func.func @transform_7(%arg0: i32) -> (i32, i32) {
    %c0_i32 = arith.constant 0 : i32
    %c0_i32_0 = arith.constant 0 : i32
    %c0_i32_1 = arith.constant 0 : i32
    return %c0_i32, %c0_i32_0 : i32, i32
  }
  func.func @transform_8(%arg0: i32) -> (i32, i32) {
    %c0_i32 = arith.constant 0 : i32
    %c0_i32_0 = arith.constant 0 : i32
    %c0_i32_1 = arith.constant 0 : i32
    return %c0_i32, %c0_i32_0 : i32, i32
  }
  func.func @transform_9(%arg0: i32) -> (i32, i32) {
    %c0_i32 = arith.constant 0 : i32
    %c0_i32_0 = arith.constant 0 : i32
    %c0_i32_1 = arith.constant 0 : i32
    return %c0_i32, %c0_i32_0 : i32, i32
  }
  func.func @transform_10(%arg0: i32) -> (i32, i32) {
    %c0_i32 = arith.constant 0 : i32
    %c0_i32_0 = arith.constant 0 : i32
    %c0_i32_1 = arith.constant 0 : i32
    return %c0_i32, %c0_i32_0 : i32, i32
  }
  func.func @transform_11(%arg0: i32) -> (i32, i32) {
    %c0_i32 = arith.constant 0 : i32
    %c0_i32_0 = arith.constant 0 : i32
    %c0_i32_1 = arith.constant 0 : i32
    return %c0_i32, %c0_i32_0 : i32, i32
  }
  func.func @transform_12(%arg0: i32) -> (i32, i32, i32) {
    %c0_i32 = arith.constant 0 : i32
    %c0_i32_0 = arith.constant 0 : i32
    %c0_i32_1 = arith.constant 0 : i32
    return %arg0, %c0_i32, %c0_i32_0 : i32, i32, i32
  }
}

</mosaic_0001>

<bundles_post_ra>
// kernel: vae_forward.1
= control target key start
LH: loop header
LB: loop body
LE: loop exit
PB: predicated region body
PF: predicated region fallthrough
CT: control target
= control target key end

     0   :  { %v3333_v41 = vmov 0   ;;  %vm678_vm0 = vcmask 130048   ;;  %vm1352_vm1 = vcmask 261120   ;;  %s4392_s2 = inlined_call_operand.vmem [shape: bf16[784,256], index: 2, kind: input, shape index: {}]   ;;  %s4393_s0 = inlined_call_operand.vmem [shape: bf16[8,784], index: 0, kind: input, shape index: {}]   ;;  %s4394_s4 = inlined_call_operand.vmem [shape: bf16[256,256], index: 4, kind: input, shape index: {}]   ;;  %s4395_s6 = inlined_call_operand.vmem [shape: bf16[256,256], index: 6, kind: input, shape index: {}]   ;;  %s4396_s3 = inlined_call_operand.vmem [shape: f32[1,256], index: 3, kind: input, shape index: {}]   ;;  %s4397_s5 = inlined_call_operand.vmem [shape: f32[1,256], index: 5, kind: input, shape index: {}]   ;;  %s4398_s8 = inlined_call_operand.vmem [shape: bf16[32,256], index: 8, kind: input, shape index: {}]   ;;  %s4399_s7 = inlined_call_operand.vmem [shape: f32[1,256], index: 7, kind: input, shape index: {}]   ;;  %s4400_s1 = inlined_call_operand.vmem [shape: f32[2,8,32], index: 1, kind: input, shape index: {}]   ;;  %s4401_s10 = inlined_call_operand.vmem [shape: bf16[256,784], index: 10, kind: input, shape index: {}]   ;;  %s4402_s9 = inlined_call_operand.vmem [shape: f32[1,256], index: 9, kind: input, shape index: {}]   ;;  %s4403_s11 = inlined_call_operand.vmem [shape: f32[1,784], index: 11, kind: input, shape index: {}]   ;;  %s4404_s12 = inlined_call_operand.vmem [shape: f32[1,8,128], index: 12, kind: output, shape index: {}]  }
   0x1   :  { %v2883_v0 = vld [vmem:[%s4392_s2 + $0x4] ss:$8 sps:$4 sm:$0xff]   ;;  %v2885_v1 = vld [vmem:[%s4392_s2] ss:$8 sps:$4 sm:$0xff]   ;;  %v2886_v2 = vld [vmem:[%s4392_s2 + $0x14] ss:$8 sps:$4 sm:$0xff]   ;;  %837 = vmatprep.mubr.bf16.mxu1 %v3333_v41 }
   0x2   :  { %682 = vmatprep.subr.bf16.mxu0 %v2883_v0  ;;  %v2888_v3 = vld [vmem:[%s4392_s2 + $0x10] ss:$8 sps:$4 sm:$0xff]   ;;  %v2889_v4 = vld [vmem:[%s4392_s2 + $0x24] ss:$8 sps:$4 sm:$0xff]   ;;  %v2891_v5 = vld [vmem:[%s4392_s2 + $0x20] ss:$8 sps:$4 sm:$0xff]  }
   0x3   :  { %683 = vmatpush1.bf16.msra.mxu0 %v2885_v1  ;;  %v2892_v6 = vld [vmem:[%s4392_s2 + $0x34] ss:$8 sps:$4 sm:$0xff]   ;;  %v2894_v7 = vld [vmem:[%s4392_s2 + $0x30] ss:$8 sps:$4 sm:$0xff]   ;;  %v2895_v8 = vld [vmem:[%s4392_s2 + $0x44] ss:$8 sps:$4 sm:$0xff]  }
   0x4   :  { %684 = vmatprep.subr.bf16.mxu0 %v2886_v2  ;;  %v2897_v9 = vld [vmem:[%s4392_s2 + $0x40] ss:$8 sps:$4 sm:$0xff]   ;;  %v2898_v10 = vld [vmem:[%s4392_s2 + $0x54] ss:$8 sps:$4 sm:$0xff]   ;;  %v2900_v11 = vld [vmem:[%s4392_s2 + $0x50] ss:$8 sps:$4 sm:$0xff]  }
   0x5   :  { %v2901_v12 = vld [vmem:[%s4392_s2 + $0x64] ss:$8 sps:$4 sm:$0xff]   ;;  %v2903_v15 = vld [vmem:[%s4392_s2 + $0x60] ss:$8 sps:$4 sm:$0xff]   ;;  %v2904_v16 = vld [vmem:[%s4392_s2 + $0x74] ss:$8 sps:$4 sm:$0xff]  }
   0x6   :  { %v43_v13 = vld [vmem:[%s4393_s0] sm:$0xff]  ;;  %v2906_v17 = vld [vmem:[%s4392_s2 + $0x70] ss:$8 sps:$4 sm:$0xff]   ;;  %v2910_v20 = vld [vmem:[%s4392_s2 + $0x94] ss:$8 sps:$4 sm:$0xff]  }
   0x7   :  { %685 = vmatpush1.bf16.msra.mxu0 %v2888_v3  ;;  %v2560_v14 = vcombine.high %v43_v13, %v43_v13  ;;  %v2907_v18 = vld [vmem:[%s4392_s2 + $0x84] ss:$8 sps:$4 sm:$0xff]   ;;  %v2909_v19 = vld [vmem:[%s4392_s2 + $0x80] ss:$8 sps:$4 sm:$0xff]   ;;  %v2912_v21 = vld [vmem:[%s4392_s2 + $0x90] ss:$8 sps:$4 sm:$0xff]   ;;  %v2559_v37 = vcombine.low %v43_v13, %v43_v13 }
   0x8   :  { %686 = vmatprep.subr.bf16.mxu0 %v2889_v4  ;;  %v2913_v22 = vld [vmem:[%s4392_s2 + $0xa4] ss:$8 sps:$4 sm:$0xff]   ;;  %v2915_v23 = vld [vmem:[%s4392_s2 + $0xa0] ss:$8 sps:$4 sm:$0xff]   ;;  %v2916_v24 = vld [vmem:[%s4392_s2 + $0xb4] ss:$8 sps:$4 sm:$0xff]  }
   0x9   :  { %714 = vmatprep.mubr.bf16.mxu0 %v2560_v14  ;;  %v2918_v25 = vld [vmem:[%s4392_s2 + $0xb0] ss:$8 sps:$4 sm:$0xff]   ;;  %v2919_v26 = vld [vmem:[%s4392_s2 + $0xc4] ss:$8 sps:$4 sm:$0xff]   ;;  %v2921_v27 = vld [vmem:[%s4392_s2 + $0xc0] ss:$8 sps:$4 sm:$0xff]  }
   0xa   :  { %v2922_v28 = vld [vmem:[%s4392_s2 + $0xd4] ss:$8 sps:$4 sm:$0xff]   ;;  %v2924_v29 = vld [vmem:[%s4392_s2 + $0xd0] ss:$8 sps:$4 sm:$0xff]   ;;  %v2925_v30 = vld [vmem:[%s4392_s2 + $0xe4] ss:$8 sps:$4 sm:$0xff]  }
   0xb   :  { %687 = vmatpush1.bf16.msra.mxu0 %v2891_v5  ;;  %v2927_v31 = vld [vmem:[%s4392_s2 + $0xe0] ss:$8 sps:$4 sm:$0xff]   ;;  %v2928_v32 = vld [vmem:[%s4392_s2 + $0xf4] ss:$8 sps:$4 sm:$0xff]   ;;  %v2930_v33 = vld [vmem:[%s4392_s2 + $0xf0] ss:$8 sps:$4 sm:$0xff]  }
   0xc   :  { %688 = vmatprep.subr.bf16.mxu0 %v2892_v6  ;;  %v2934_v34 = vld [vmem:[%s4392_s2 + $0x104] ss:$8 sps:$4 sm:$0xff]   ;;  %v2932_v36 = vld [vmem:[%s4392_s2 + $0x100] ss:$8 sps:$4 sm:$0xff]   ;;  %v2938_v38 = vld [vmem:[%s4392_s2 + $0x114] ss:$8 sps:$4 sm:$0xff]  }
   0xd   :  { %v3504_v35 = vld [vmem:[%s4393_s0 + $0x8] sm:$0xff]  ;;  %v2936_v43 = vld [vmem:[%s4392_s2 + $0x110] ss:$8 sps:$4 sm:$0xff]   ;;  %v3042_v49 = vld [vmem:[%s4394_s4 + $0x14] ss:$8 sps:$4 sm:$0xff]  }
   0xe   :  { %v2562_v39 = vcombine.high %v3504_v35, %v3504_v35  ;;  %v3028_v40 = vld [vmem:[%s4392_s2 + $0x304] ss:$8 sps:$4 sm:$0xff]   ;;  %v3033_v42 = vld [vmem:[%s4392_s2 + $0x300] ss:$8 sps:$4 sm:$0xff]   ;;  %v46_v45 = vld [vmem:[%s4393_s0 + $0x18] sm:$0xf] }
   0xf   :  { %689 = vmatpush1.bf16.msra.mxu0 %v2894_v7  ;;  %v2941_v44 = vld [vmem:[%s4392_s2 + $0x124] ss:$8 sps:$4 sm:$0xff]   ;;  %805 = vmatprep.subr.bf16.mxu1 %v3028_v40  ;;  %v2565_v46 = vcombine.low %v46_v45, %v46_v45  ;;  %v3037_v47 = vld [vmem:[%s4394_s4] ss:$8 sps:$4 sm:$0xff]   ;;  %v2944_v51 = vld [vmem:[%s4392_s2 + $0x134] ss:$8 sps:$4 sm:$0xff]  }
  0x10   :  { %690 = vmatprep.subr.bf16.mxu0 %v2895_v8  ;;  %806 = vmatpush1.bf16.msra.mxu1 %v3033_v42  ;;  %v3039_v48 = vld [vmem:[%s4394_s4 + $0x4] ss:$8 sps:$4 sm:$0xff]   ;;  %v2939_v50 = vld [vmem:[%s4392_s2 + $0x120] ss:$8 sps:$4 sm:$0xff]   ;;  %v3040_v52 = vld [vmem:[%s4394_s4 + $0x10] ss:$8 sps:$4 sm:$0xff]  }
  0x11   :  { %1054 = vmatprep.subr.bf16.mxu1 %v3039_v48  ;;  %v3045_v53 = vld [vmem:[%s4394_s4 + $0x24] ss:$8 sps:$4 sm:$0xff]   ;;  %v2942_v54 = vld [vmem:[%s4392_s2 + $0x130] ss:$8 sps:$4 sm:$0xff]   ;;  %v3043_v56 = vld [vmem:[%s4394_s4 + $0x20] ss:$8 sps:$4 sm:$0xff]  }
  0x12   :  { %v2947_v55 = vld [vmem:[%s4392_s2 + $0x144] ss:$8 sps:$4 sm:$0xff]   ;;  %v3048_v57 = vld [vmem:[%s4394_s4 + $0x34] ss:$8 sps:$4 sm:$0xff]   ;;  %v2945_v58 = vld [vmem:[%s4392_s2 + $0x140] ss:$8 sps:$4 sm:$0xff]  }
  0x13   :  { %691 = vmatpush1.bf16.msra.mxu0 %v2897_v9  ;;  %2664 = vmatmul.mubr.msk.bf16.vlgmr.msra.gmra.mrb[0].mxu1 %vm678_vm0, %v2565_v46  ;;  %v2950_v59 = vld [vmem:[%s4392_s2 + $0x154] ss:$8 sps:$4 sm:$0xff]   ;;  %v3046_v60 = vld [vmem:[%s4394_s4 + $0x30] ss:$8 sps:$4 sm:$0xff]   ;;  %v3051_v61 = vld [vmem:[%s4394_s4 + $0x44] ss:$8 sps:$4 sm:$0xff]  }
  0x14   :  { %692 = vmatprep.subr.bf16.mxu0 %v2898_v10  ;;  %1055 = vmatpush1.bf16.msra.mxu1 %v3037_v47  ;;  %v2948_v62 = vld [vmem:[%s4392_s2 + $0x150] ss:$8 sps:$4 sm:$0xff]   ;;  %v2953_v63 = vld [vmem:[%s4392_s2 + $0x164] ss:$8 sps:$4 sm:$0xff]   ;;  %v3049_v0 = vld [vmem:[%s4394_s4 + $0x40] ss:$8 sps:$4 sm:$0xff]  }
  0x15   :  { %1056 = vmatprep.subr.bf16.mxu1 %v3042_v49  ;;  %v3054_v1 = vld [vmem:[%s4394_s4 + $0x54] ss:$8 sps:$4 sm:$0xff]   ;;  %v2951_v2 = vld [vmem:[%s4392_s2 + $0x160] ss:$8 sps:$4 sm:$0xff]   ;;  %v3052_v4 = vld [vmem:[%s4394_s4 + $0x50] ss:$8 sps:$4 sm:$0xff]  }
  0x16   :  { %v2956_v3 = vld [vmem:[%s4392_s2 + $0x174] ss:$8 sps:$4 sm:$0xff]   ;;  %v3057_v5 = vld [vmem:[%s4394_s4 + $0x64] ss:$8 sps:$4 sm:$0xff]   ;;  %v2954_v6 = vld [vmem:[%s4392_s2 + $0x170] ss:$8 sps:$4 sm:$0xff]  }
  0x17   :  { %693 = vmatpush1.bf16.msra.mxu0 %v2900_v11  ;;  %v2959_v7 = vld [vmem:[%s4392_s2 + $0x184] ss:$8 sps:$4 sm:$0xff]   ;;  %v3055_v8 = vld [vmem:[%s4394_s4 + $0x60] ss:$8 sps:$4 sm:$0xff]   ;;  %v3060_v9 = vld [vmem:[%s4394_s4 + $0x74] ss:$8 sps:$4 sm:$0xff]  }
  0x18   :  { %694 = vmatprep.subr.bf16.mxu0 %v2901_v12  ;;  %1057 = vmatpush1.bf16.msra.mxu1 %v3040_v52  ;;  %v2957_v10 = vld [vmem:[%s4392_s2 + $0x180] ss:$8 sps:$4 sm:$0xff]   ;;  %v2962_v11 = vld [vmem:[%s4392_s2 + $0x194] ss:$8 sps:$4 sm:$0xff]   ;;  %v3058_v12 = vld [vmem:[%s4394_s4 + $0x70] ss:$8 sps:$4 sm:$0xff]  }
  0x19   :  { %1058 = vmatprep.subr.bf16.mxu1 %v3045_v53  ;;  %v3063_v13 = vld [vmem:[%s4394_s4 + $0x84] ss:$8 sps:$4 sm:$0xff]   ;;  %v2960_v14 = vld [vmem:[%s4392_s2 + $0x190] ss:$8 sps:$4 sm:$0xff]   ;;  %v2982_v40 = vld [vmem:[%s4392_s2 + $0x200] ss:$8 sps:$4 sm:$0xff]  }
  0x1a   :  { %v2989_v45 = vld [vmem:[%s4392_s2 + $0x220] ss:$8 sps:$4 sm:$0xff]   ;;  %v2994_v46 = vld [vmem:[%s4392_s2 + $0x234] ss:$8 sps:$4 sm:$0xff]   ;;  %v2992_v47 = vld [vmem:[%s4392_s2 + $0x230] ss:$8 sps:$4 sm:$0xff]  }
  0x1b   :  { %695 = vmatpush1.bf16.msra.mxu0 %v2903_v15  ;;  %v2965_v15 = vld [vmem:[%s4392_s2 + $0x1a4] ss:$8 sps:$4 sm:$0xff]   ;;  %v2995_v49 = vld [vmem:[%s4392_s2 + $0x240] ss:$8 sps:$4 sm:$0xff]  }
  0x1c   :  { %696 = vmatprep.subr.bf16.mxu0 %v2904_v16  ;;  %1059 = vmatpush1.bf16.msra.mxu1 %v3043_v56  ;;  %v3061_v16 = vld [vmem:[%s4394_s4 + $0x80] ss:$8 sps:$4 sm:$0xff]   ;;  %v2997_v48 = vld [vmem:[%s4392_s2 + $0x244] ss:$8 sps:$4 sm:$0xff]   ;;  %v3078_v56 = vld [vmem:[%s4394_s4 + $0xd4] ss:$8 sps:$4 sm:$0xff]  }
  0x1d   :  { %1060 = vmatprep.subr.bf16.mxu1 %v3048_v57  ;;  %v3003_v52 = vld [vmem:[%s4392_s2 + $0x264] ss:$8 sps:$4 sm:$0xff]   ;;  %v3001_v53 = vld [vmem:[%s4392_s2 + $0x260] ss:$8 sps:$4 sm:$0xff]   ;;  %v3004_v57 = vld [vmem:[%s4392_s2 + $0x270] ss:$8 sps:$4 sm:$0xff]  }
  0x1f   :  { %697 = vmatpush1.bf16.msra.mxu0 %v2906_v17  ;;  %v3066_v17 = vld [vmem:[%s4394_s4 + $0x94] ss:$8 sps:$4 sm:$0xff]  }
  0x20   :  { %698 = vmatprep.subr.bf16.mxu0 %v2907_v18  ;;  %1061 = vmatpush1.bf16.msra.mxu1 %v3046_v60  ;;  %v2963_v18 = vld [vmem:[%s4392_s2 + $0x1a0] ss:$8 sps:$4 sm:$0xff]   ;;  %v3012_v60 = vld [vmem:[%s4392_s2 + $0x294] ss:$8 sps:$4 sm:$0xff]  }
  0x21   :  { %1062 = vmatprep.subr.bf16.mxu1 %v3051_v61  ;;  %v3010_v61 = vld [vmem:[%s4392_s2 + $0x290] ss:$8 sps:$4 sm:$0xff]  }
  0x23   :  { %699 = vmatpush1.bf16.msra.mxu0 %v2909_v19  ;;  %v2968_v19 = vld [vmem:[%s4392_s2 + $0x1b4] ss:$8 sps:$4 sm:$0xff]  }
  0x24   :  { %700 = vmatprep.subr.bf16.mxu0 %v2910_v20  ;;  %1063 = vmatpush1.bf16.msra.mxu1 %v3049_v0  ;;  %v3064_v20 = vld [vmem:[%s4394_s4 + $0x90] ss:$8 sps:$4 sm:$0xff]   ;;  %v3018_v0 = vld [vmem:[%s4392_s2 + $0x2b4] ss:$8 sps:$4 sm:$0xff]  }
  0x25   :  { %1064 = vmatprep.subr.bf16.mxu1 %v3054_v1  ;;  %v3016_v1 = vld [vmem:[%s4392_s2 + $0x2b0] ss:$8 sps:$4 sm:$0xff]  }
  0x27   :  { %701 = vmatpush1.bf16.msra.mxu0 %v2912_v21  ;;  %v3069_v21 = vld [vmem:[%s4394_s4 + $0xa4] ss:$8 sps:$4 sm:$0xff]  }
  0x28   :  { %702 = vmatprep.subr.bf16.mxu0 %v2913_v22  ;;  %1065 = vmatpush1.bf16.msra.mxu1 %v3052_v4  ;;  %v2966_v22 = vld [vmem:[%s4392_s2 + $0x1b0] ss:$8 sps:$4 sm:$0xff]   ;;  %v3024_v4 = vld [vmem:[%s4392_s2 + $0x2d4] ss:$8 sps:$4 sm:$0xff]  }
  0x29   :  { %1066 = vmatprep.subr.bf16.mxu1 %v3057_v5  ;;  %v3022_v5 = vld [vmem:[%s4392_s2 + $0x2d0] ss:$8 sps:$4 sm:$0xff]  }
  0x2b   :  { %703 = vmatpush1.bf16.msra.mxu0 %v2915_v23  ;;  %v2971_v23 = vld [vmem:[%s4392_s2 + $0x1c4] ss:$8 sps:$4 sm:$0xff]  }
  0x2c   :  { %704 = vmatprep.subr.bf16.mxu0 %v2916_v24  ;;  %1067 = vmatpush1.bf16.msra.mxu1 %v3055_v8  ;;  %v3067_v24 = vld [vmem:[%s4394_s4 + $0xa0] ss:$8 sps:$4 sm:$0xff]   ;;  %v3032_v8 = vld [vmem:[%s4392_s2 + $0x2f4] ss:$8 sps:$4 sm:$0xff]  }
  0x2d   :  { %1068 = vmatprep.subr.bf16.mxu1 %v3060_v9  ;;  %v3030_v9 = vld [vmem:[%s4392_s2 + $0x2f0] ss:$8 sps:$4 sm:$0xff]  }
  0x2f   :  { %705 = vmatpush1.bf16.msra.mxu0 %v2918_v25  ;;  %v3072_v25 = vld [vmem:[%s4394_s4 + $0xb4] ss:$8 sps:$4 sm:$0xff]  }
  0x30   :  { %706 = vmatprep.subr.bf16.mxu0 %v2919_v26  ;;  %1069 = vmatpush1.bf16.msra.mxu1 %v3058_v12  ;;  %v2969_v26 = vld [vmem:[%s4392_s2 + $0x1c0] ss:$8 sps:$4 sm:$0xff]  }
  0x31   :  { %1070 = vmatprep.subr.bf16.mxu1 %v3063_v13  ;;  %v3079_v12 = vld [vmem:[%s4394_s4 + $0xe0] ss:$8 sps:$4 sm:$0xff]  }
  0x33   :  { %707 = vmatpush1.bf16.msra.mxu0 %v2921_v27  ;;  %v2974_v27 = vld [vmem:[%s4392_s2 + $0x1d4] ss:$8 sps:$4 sm:$0xff]  }
  0x34   :  { %708 = vmatprep.subr.bf16.mxu0 %v2922_v28  ;;  %1071 = vmatpush1.bf16.msra.mxu1 %v3061_v16  ;;  %v3070_v28 = vld [vmem:[%s4394_s4 + $0xb0] ss:$8 sps:$4 sm:$0xff]  }
  0x35   :  { %1072 = vmatprep.subr.bf16.mxu1 %v3066_v17  ;;  %v3082_v16 = vld [vmem:[%s4394_s4 + $0xf0] ss:$8 sps:$4 sm:$0xff]  }
  0x37   :  { %709 = vmatpush1.bf16.msra.mxu0 %v2924_v29  ;;  %v3075_v29 = vld [vmem:[%s4394_s4 + $0xc4] ss:$8 sps:$4 sm:$0xff]  }
  0x38   :  { %710 = vmatprep.subr.bf16.mxu0 %v2925_v30  ;;  %1073 = vmatpush1.bf16.msra.mxu1 %v3064_v20  ;;  %v2972_v30 = vld [vmem:[%s4392_s2 + $0x1d0] ss:$8 sps:$4 sm:$0xff]   ;;  %v154_v20 = vlaneseq }
  0x39   :  { %1074 = vmatprep.subr.bf16.mxu1 %v3069_v21 }
  0x3a   :  { %v3818_v21 = vshrl.u32 %v154_v20, 7  ;;  %v3133_v20 = vld [vmem:[%s4398_s8] ss:$8 sps:$4 sm:$0xff]  }
  0x3b   :  { %711 = vmatpush1.bf16.msra.mxu0 %v2927_v31  ;;  %v2977_v31 = vld [vmem:[%s4392_s2 + $0x1e4] ss:$8 sps:$4 sm:$0xff]  }
  0x3c   :  { %712 = vmatprep.subr.bf16.mxu0 %v2928_v32  ;;  %1075 = vmatpush1.bf16.msra.mxu1 %v3067_v24  ;;  %v3073_v32 = vld [vmem:[%s4394_s4 + $0xc0] ss:$8 sps:$4 sm:$0xff]   ;;  %v3827_v24 = vsub.s32 1, %v3818_v21 }
  0x3d   :  { %1076 = vmatprep.subr.bf16.mxu1 %v3072_v25 }
  0x3f   :  { %713 = vmatpush1.bf16.msra.mxu0 %v2930_v33  ;;  %v2975_v33 = vld [vmem:[%s4392_s2 + $0x1e0] ss:$8 sps:$4 sm:$0xff]  }
  0x40   :  { %723 = vmatprep.subr.bf16.mxu0 %v2934_v34  ;;  %1077 = vmatpush1.bf16.msra.mxu1 %v3070_v28  ;;  %v2980_v34 = vld [vmem:[%s4392_s2 + $0x1f4] ss:$8 sps:$4 sm:$0xff]  }
  0x41   :  { %1078 = vmatprep.subr.bf16.mxu1 %v3075_v29 }
  0x42   :  { %715 = vmatmul.mubr.bf16.vlgmr.msra.gmra.mrb[0].mxu0 %v2559_v37  ;;  %v2984_v37 = vld [vmem:[%s4392_s2 + $0x204] ss:$8 sps:$4 sm:$0xff]  }
  0x43   :  { %724 = vmatpush1.bf16.msra.mxu0 %v2932_v36  ;;  %755 = vmatprep.mubr.bf16.mxu0 %v2562_v39  ;;  %v2978_v36 = vld [vmem:[%s4392_s2 + $0x1f0] ss:$8 sps:$4 sm:$0xff]   ;;  %v2561_v39 = vcombine.low %v3504_v35, %v3504_v35  ;;  %v2991_v35 = vld [vmem:[%s4392_s2 + $0x224] ss:$8 sps:$4 sm:$0xff]  }
  0x44   :  { %725 = vmatprep.subr.bf16.mxu0 %v2938_v38  ;;  %1079 = vmatpush1.bf16.msra.mxu1 %v3073_v32  ;;  %v3696_v38 = vld [vmem:[%s4393_s0 + $0x10] sm:$0xff] }
  0x45   :  { %v2564_v42 = vcombine.high %v3696_v38, %v3696_v38  ;;  %1080 = vmatprep.subr.bf16.mxu1 %v3078_v56  ;;  %v3109_v56 = vld [vmem:[%s4395_s6 + $0x80] ss:$8 sps:$4 sm:$0xff]  }
  0x47   :  { %726 = vmatpush1.bf16.msra.mxu0 %v2936_v43  ;;  %v2988_v43 = vld [vmem:[%s4392_s2 + $0x214] ss:$8 sps:$4 sm:$0xff]  }
  0x48   :  { %727 = vmatprep.subr.bf16.mxu0 %v2941_v44  ;;  %v2986_v44 = vld [vmem:[%s4392_s2 + $0x210] ss:$8 sps:$4 sm:$0xff]  }
  0x4b   :  { %728 = vmatpush1.bf16.msra.mxu0 %v2939_v50  ;;  %v3000_v50 = vld [vmem:[%s4392_s2 + $0x254] ss:$8 sps:$4 sm:$0xff]  }
  0x4c   :  { %729 = vmatprep.subr.bf16.mxu0 %v2944_v51  ;;  %v2998_v51 = vld [vmem:[%s4392_s2 + $0x250] ss:$8 sps:$4 sm:$0xff]  }
  0x4f   :  { %730 = vmatpush1.bf16.msra.mxu0 %v2942_v54  ;;  %v3006_v54 = vld [vmem:[%s4392_s2 + $0x274] ss:$8 sps:$4 sm:$0xff]  }
  0x50   :  { %731 = vmatprep.subr.bf16.mxu0 %v2947_v55  ;;  %v3076_v55 = vld [vmem:[%s4394_s4 + $0xd0] ss:$8 sps:$4 sm:$0xff]  }
  0x51   :  { %1081 = vmatpush1.bf16.msra.mxu1 %v3076_v55  ;;  %v3111_v55 = vld [vmem:[%s4395_s6 + $0x84] ss:$8 sps:$4 sm:$0xff]  }
  0x53   :  { %732 = vmatpush1.bf16.msra.mxu0 %v2945_v58  ;;  %v3009_v58 = vld [vmem:[%s4392_s2 + $0x284] ss:$8 sps:$4 sm:$0xff]  }
  0x54   :  { %733 = vmatprep.subr.bf16.mxu0 %v2950_v59  ;;  %v3007_v59 = vld [vmem:[%s4392_s2 + $0x280] ss:$8 sps:$4 sm:$0xff]  }
  0x57   :  { %734 = vmatpush1.bf16.msra.mxu0 %v2948_v62  ;;  %v3015_v62 = vld [vmem:[%s4392_s2 + $0x2a4] ss:$8 sps:$4 sm:$0xff]  }
  0x58   :  { %735 = vmatprep.subr.bf16.mxu0 %v2953_v63  ;;  %v3013_v63 = vld [vmem:[%s4392_s2 + $0x2a0] ss:$8 sps:$4 sm:$0xff]  }
  0x5b   :  { %736 = vmatpush1.bf16.msra.mxu0 %v2951_v2  ;;  %v3021_v2 = vld [vmem:[%s4392_s2 + $0x2c4] ss:$8 sps:$4 sm:$0xff]  }
  0x5c   :  { %737 = vmatprep.subr.bf16.mxu0 %v2956_v3  ;;  %v3019_v3 = vld [vmem:[%s4392_s2 + $0x2c0] ss:$8 sps:$4 sm:$0xff]  }
  0x5f   :  { %738 = vmatpush1.bf16.msra.mxu0 %v2954_v6  ;;  %v3027_v6 = vld [vmem:[%s4392_s2 + $0x2e4] ss:$8 sps:$4 sm:$0xff]  }
  0x60   :  { %739 = vmatprep.subr.bf16.mxu0 %v2959_v7  ;;  %v3025_v7 = vld [vmem:[%s4392_s2 + $0x2e0] ss:$8 sps:$4 sm:$0xff]  }
  0x63   :  { %740 = vmatpush1.bf16.msra.mxu0 %v2957_v10  ;;  %v2563_v10 = vcombine.low %v3696_v38, %v3696_v38 }
  0x64   :  { %741 = vmatprep.subr.bf16.mxu0 %v2962_v11  ;;  %v3081_v11 = vld [vmem:[%s4394_s4 + $0xe4] ss:$8 sps:$4 sm:$0xff]  }
  0x65   :  { %1082 = vmatprep.subr.bf16.mxu1 %v3081_v11 }
  0x66   :  { %1083 = vmatpush1.bf16.msra.mxu1 %v3079_v12 }
  0x67   :  { %742 = vmatpush1.bf16.msra.mxu0 %v2960_v14  ;;  %v3084_v14 = vld [vmem:[%s4394_s4 + $0xf4] ss:$8 sps:$4 sm:$0xff]  }
  0x68   :  { %743 = vmatprep.subr.bf16.mxu0 %v2965_v15  ;;  %1084 = vmatprep.subr.bf16.mxu1 %v3084_v14 }
  0x6a   :  { %1085 = vmatpush1.bf16.msra.mxu1 %v3082_v16 }
  0x6b   :  { %744 = vmatpush1.bf16.msra.mxu0 %v2963_v18 }
  0x6c   :  { %745 = vmatprep.subr.bf16.mxu0 %v2968_v19  ;;  %v3087_v19 = vld [vmem:[%s4395_s6 + $0x4] ss:$8 sps:$4 sm:$0xff]  }
  0x6d   :  { %1303 = vmatprep.subr.bf16.mxu1 %v3087_v19 }
  0x6f   :  { %746 = vmatpush1.bf16.msra.mxu0 %v2966_v22  ;;  %v3821_v22 = vsub.s32 0, %v3818_v21 }
  0x70   :  { %747 = vmatprep.subr.bf16.mxu0 %v2971_v23  ;;  %v152_v23 = vld [vmem:[%s4396_s3] sm:$0x3] }
  0x71   :  { %v157_v25 = vrot.slane %v152_v23, %v3821_v22 }
  0x73   :  { %748 = vmatpush1.bf16.msra.mxu0 %v2969_v26  ;;  %v161_v26 = vrot.slane %v152_v23, %v3827_v24  ;;  %v3135_v23 = vld [vmem:[%s4398_s8 + $0x4] ss:$8 sps:$4 sm:$0xff]  }
  0x74   :  { %749 = vmatprep.subr.bf16.mxu0 %v2974_v27 }
  0x77   :  { %750 = vmatpush1.bf16.msra.mxu0 %v2972_v30 }
  0x78   :  { %751 = vmatprep.subr.bf16.mxu0 %v2977_v31 }
  0x7b   :  { %752 = vmatpush1.bf16.msra.mxu0 %v2975_v33 }
  0x7c   :  { %753 = vmatprep.subr.bf16.mxu0 %v2980_v34 }
  0x7f   :  { %754 = vmatpush1.bf16.msra.mxu0 %v2978_v36 }
  0x80   :  { %764 = vmatprep.subr.bf16.mxu0 %v2984_v37 }
  0x82   :  { %756 = vmatmul.mubr.bf16.vlgmr.msra.gmra.mrb[0].mxu0 %v2561_v39  ;;  %v3085_v39 = vld [vmem:[%s4395_s6] ss:$8 sps:$4 sm:$0xff]  }
  0x83   :  { %765 = vmatpush1.bf16.msra.mxu0 %v2982_v40  ;;  %796 = vmatprep.mubr.bf16.mxu0 %v2564_v42  ;;  %v3090_v42 = vld [vmem:[%s4395_s6 + $0x14] ss:$8 sps:$4 sm:$0xff]  }
  0x84   :  { %766 = vmatprep.subr.bf16.mxu0 %v2988_v43  ;;  %v3088_v43 = vld [vmem:[%s4395_s6 + $0x10] ss:$8 sps:$4 sm:$0xff]  }
  0x87   :  { %767 = vmatpush1.bf16.msra.mxu0 %v2986_v44  ;;  %v3093_v44 = vld [vmem:[%s4395_s6 + $0x24] ss:$8 sps:$4 sm:$0xff]  }
  0x88   :  { %768 = vmatprep.subr.bf16.mxu0 %v2991_v35  ;;  %v3091_v35 = vld [vmem:[%s4395_s6 + $0x20] ss:$8 sps:$4 sm:$0xff]  }
  0x8b   :  { %769 = vmatpush1.bf16.msra.mxu0 %v2989_v45  ;;  %v3096_v45 = vld [vmem:[%s4395_s6 + $0x34] ss:$8 sps:$4 sm:$0xff]  }
  0x8c   :  { %770 = vmatprep.subr.bf16.mxu0 %v2994_v46  ;;  %v3094_v46 = vld [vmem:[%s4395_s6 + $0x30] ss:$8 sps:$4 sm:$0xff]  }
  0x8f   :  { %771 = vmatpush1.bf16.msra.mxu0 %v2992_v47  ;;  %v3099_v47 = vld [vmem:[%s4395_s6 + $0x44] ss:$8 sps:$4 sm:$0xff]  }
  0x90   :  { %772 = vmatprep.subr.bf16.mxu0 %v2997_v48  ;;  %v3097_v48 = vld [vmem:[%s4395_s6 + $0x40] ss:$8 sps:$4 sm:$0xff]  }
  0x93   :  { %773 = vmatpush1.bf16.msra.mxu0 %v2995_v49  ;;  %v3102_v49 = vld [vmem:[%s4395_s6 + $0x54] ss:$8 sps:$4 sm:$0xff]  }
  0x94   :  { %774 = vmatprep.subr.bf16.mxu0 %v3000_v50  ;;  %v3100_v50 = vld [vmem:[%s4395_s6 + $0x50] ss:$8 sps:$4 sm:$0xff]  }
  0x97   :  { %775 = vmatpush1.bf16.msra.mxu0 %v2998_v51  ;;  %v3105_v51 = vld [vmem:[%s4395_s6 + $0x64] ss:$8 sps:$4 sm:$0xff]  }
  0x98   :  { %776 = vmatprep.subr.bf16.mxu0 %v3003_v52  ;;  %v3103_v52 = vld [vmem:[%s4395_s6 + $0x60] ss:$8 sps:$4 sm:$0xff]  }
  0x9b   :  { %777 = vmatpush1.bf16.msra.mxu0 %v3001_v53  ;;  %v3108_v53 = vld [vmem:[%s4395_s6 + $0x74] ss:$8 sps:$4 sm:$0xff]  }
  0x9c   :  { %778 = vmatprep.subr.bf16.mxu0 %v3006_v54  ;;  %v3106_v54 = vld [vmem:[%s4395_s6 + $0x70] ss:$8 sps:$4 sm:$0xff]  }
  0x9f   :  { %779 = vmatpush1.bf16.msra.mxu0 %v3004_v57  ;;  %v3114_v57 = vld [vmem:[%s4395_s6 + $0x94] ss:$8 sps:$4 sm:$0xff]  }
  0xa0   :  { %780 = vmatprep.subr.bf16.mxu0 %v3009_v58  ;;  %v3112_v58 = vld [vmem:[%s4395_s6 + $0x90] ss:$8 sps:$4 sm:$0xff]  }
  0xa3   :  { %781 = vmatpush1.bf16.msra.mxu0 %v3007_v59  ;;  %v3117_v59 = vld [vmem:[%s4395_s6 + $0xa4] ss:$8 sps:$4 sm:$0xff]  }
  0xa4   :  { %782 = vmatprep.subr.bf16.mxu0 %v3012_v60  ;;  %v3115_v60 = vld [vmem:[%s4395_s6 + $0xa0] ss:$8 sps:$4 sm:$0xff]  }
  0xa7   :  { %783 = vmatpush1.bf16.msra.mxu0 %v3010_v61  ;;  %v3120_v61 = vld [vmem:[%s4395_s6 + $0xb4] ss:$8 sps:$4 sm:$0xff]  }
  0xa8   :  { %784 = vmatprep.subr.bf16.mxu0 %v3015_v62  ;;  %v3118_v62 = vld [vmem:[%s4395_s6 + $0xb0] ss:$8 sps:$4 sm:$0xff]  }
  0xab   :  { %785 = vmatpush1.bf16.msra.mxu0 %v3013_v63  ;;  %v3123_v63 = vld [vmem:[%s4395_s6 + $0xc4] ss:$8 sps:$4 sm:$0xff]  }
  0xac   :  { %786 = vmatprep.subr.bf16.mxu0 %v3018_v0  ;;  %v3121_v0 = vld [vmem:[%s4395_s6 + $0xc0] ss:$8 sps:$4 sm:$0xff]  }
  0xaf   :  { %787 = vmatpush1.bf16.msra.mxu0 %v3016_v1  ;;  %v3126_v1 = vld [vmem:[%s4395_s6 + $0xd4] ss:$8 sps:$4 sm:$0xff]  }
  0xb0   :  { %788 = vmatprep.subr.bf16.mxu0 %v3021_v2  ;;  %v3124_v2 = vld [vmem:[%s4395_s6 + $0xd0] ss:$8 sps:$4 sm:$0xff]  }
  0xb3   :  { %789 = vmatpush1.bf16.msra.mxu0 %v3019_v3  ;;  %v3129_v3 = vld [vmem:[%s4395_s6 + $0xe4] ss:$8 sps:$4 sm:$0xff]  }
  0xb4   :  { %790 = vmatprep.subr.bf16.mxu0 %v3024_v4  ;;  %v3127_v4 = vld [vmem:[%s4395_s6 + $0xe0] ss:$8 sps:$4 sm:$0xff]  }
  0xb7   :  { %791 = vmatpush1.bf16.msra.mxu0 %v3022_v5  ;;  %v3132_v5 = vld [vmem:[%s4395_s6 + $0xf4] ss:$8 sps:$4 sm:$0xff]  }
  0xb8   :  { %792 = vmatprep.subr.bf16.mxu0 %v3027_v6  ;;  %v3130_v6 = vld [vmem:[%s4395_s6 + $0xf0] ss:$8 sps:$4 sm:$0xff]  }
  0xbb   :  { %793 = vmatpush1.bf16.msra.mxu0 %v3025_v7  ;;  %v882_v7 = vld [vmem:[%s4397_s5] sm:$0x3] }
  0xbc   :  { %794 = vmatprep.subr.bf16.mxu0 %v3032_v8  ;;  %v887_v8 = vrot.slane %v882_v7, %v3821_v22 }
  0xbf   :  { %795 = vmatpush1.bf16.msra.mxu0 %v3030_v9  ;;  %v891_v9 = vrot.slane %v882_v7, %v3827_v24  ;;  %v3166_v7 = vld [vmem:[%s4401_s10 + $0xe8] ss:$28 sps:$4 sm:$0xff]  }
  0xc2   :  { %797 = vmatmul.mubr.bf16.vlgmr.msra.gmra.mrb[0].mxu0 %v2563_v10 }
  0xe6   :  { %v839_v13 = vpop.f32.mrb[0].mxu1 }
  0xe7   :  { %v841_v15 = vpop.f32.mrb[1].mxu1 }
  0xe8   :  { %v843_v17 = vpop.f32.mrb[2].mxu1 }
  0xe9   :  { %v844_v18 = vpop.f32.mrb[3].mxu1 }
 0x195   :  { %v798_v27 = vpop.f32.mrb[0].mxu0 }
 0x196   :  { %v2870_v28 = vadd.f32 %v798_v27, %v157_v25  ;;  %v800_v29 = vpop.f32.mrb[1].mxu0  ;;  %v3138_v25 = vld [vmem:[%s4398_s8 + $0x14] ss:$8 sps:$4 sm:$0xff]  }
 0x197   :  { %v2872_v30 = vadd.f32 %v800_v29, %v161_v26  ;;  %v802_v31 = vpop.f32.mrb[2].mxu0  ;;  %v3136_v26 = vld [vmem:[%s4398_s8 + $0x10] ss:$8 sps:$4 sm:$0xff]  }
 0x198   :  { %v2871_v32 = vadd.f32 %v2870_v28, %v839_v13  ;;  %v803_v33 = vpop.f32.mrb[3].mxu0 }
 0x199   :  { %v2873_v34 = vadd.f32 %v2872_v30, %v841_v15 }
 0x19a   :  { %v846_v36 = vmax.f32 %v2871_v32, 0.0 }
 0x19b   :  { %v847_v37 = vmax.f32 %v2873_v34, 0.0 }
 0x19c   :  { %v848_v40 = vpack.c.bf16 %v846_v36, %v846_v36 }
 0x19d   :  { %v849_v38 = vpack.c.bf16 %v847_v37, %v847_v37 }
 0x19f   :  { %1086 = vmatprep.mubr.bf16.mxu1 %v849_v38  ;;  %v1357_v38 = vld [vmem:[%s4400_s1] sm:$0xff] }
 0x1a0   :  { %1087 = vmatmul.mubr.bf16.vlgmr.msra.gmra.mrb[4].mxu1 %v848_v40 }
 0x1a1   :  { %1304 = vmatpush1.bf16.msra.mxu1 %v3085_v39  ;;  %v2730_v39 = vld [vmem:[%s4400_s1 + $0x8] sm:$0xff] }
 0x1a2   :  { %1305 = vmatprep.subr.bf16.mxu1 %v3090_v42 }
 0x1a5   :  { %1306 = vmatpush1.bf16.msra.mxu1 %v3088_v43 }
 0x1a6   :  { %1307 = vmatprep.subr.bf16.mxu1 %v3093_v44 }
 0x1a9   :  { %1308 = vmatpush1.bf16.msra.mxu1 %v3091_v35 }
 0x1aa   :  { %1309 = vmatprep.subr.bf16.mxu1 %v3096_v45 }
 0x1ad   :  { %1310 = vmatpush1.bf16.msra.mxu1 %v3094_v46 }
 0x1ae   :  { %1311 = vmatprep.subr.bf16.mxu1 %v3099_v47 }
 0x1b1   :  { %1312 = vmatpush1.bf16.msra.mxu1 %v3097_v48 }
 0x1b2   :  { %1313 = vmatprep.subr.bf16.mxu1 %v3102_v49 }
 0x1b5   :  { %1314 = vmatpush1.bf16.msra.mxu1 %v3100_v50 }
 0x1b6   :  { %1315 = vmatprep.subr.bf16.mxu1 %v3105_v51 }
 0x1b9   :  { %1316 = vmatpush1.bf16.msra.mxu1 %v3103_v52  ;;  %v3139_v52 = vld [vmem:[%s4401_s10] ss:$28 sps:$4 sm:$0xff]  }
 0x1ba   :  { %1317 = vmatprep.subr.bf16.mxu1 %v3108_v53  ;;  %v3141_v53 = vld [vmem:[%s4401_s10 + $0x4] ss:$28 sps:$4 sm:$0xff]  }
 0x1bd   :  { %1318 = vmatpush1.bf16.msra.mxu1 %v3106_v54  ;;  %v3142_v54 = vld [vmem:[%s4401_s10 + $0x8] ss:$28 sps:$4 sm:$0xff]  }
 0x1be   :  { %1319 = vmatprep.subr.bf16.mxu1 %v3111_v55  ;;  %v3144_v55 = vld [vmem:[%s4401_s10 + $0xc] ss:$28 sps:$4 sm:$0xff]  }
 0x1bf   :  { %2237 = vmatprep.subr.bf16.mxu0 %v3144_v55  ;;  %v3237_v55 = vld [vmem:[%s4401_s10 + $0x14] ss:$28 sps:$4 sm:$0xff]  }
 0x1c0   :  { %2238 = vmatpush1.bf16.msra.mxu0 %v3142_v54  ;;  %v3232_v54 = vld [vmem:[%s4401_s10 + $0x350] ss:$28 sps:$4 sm:$0xff]  }
 0x1c1   :  { %1320 = vmatpush1.bf16.msra.mxu1 %v3109_v56  ;;  %v3145_v56 = vld [vmem:[%s4401_s10 + $0x38] ss:$28 sps:$4 sm:$0xff]  }
 0x1c2   :  { %1321 = vmatprep.subr.bf16.mxu1 %v3114_v57  ;;  %v3147_v57 = vld [vmem:[%s4401_s10 + $0x3c] ss:$28 sps:$4 sm:$0xff]  }
 0x1c5   :  { %1322 = vmatpush1.bf16.msra.mxu1 %v3112_v58  ;;  %v3148_v58 = vld [vmem:[%s4401_s10 + $0x40] ss:$28 sps:$4 sm:$0xff]  }
 0x1c6   :  { %1323 = vmatprep.subr.bf16.mxu1 %v3117_v59  ;;  %v3150_v59 = vld [vmem:[%s4401_s10 + $0x44] ss:$28 sps:$4 sm:$0xff]  }
 0x1c7   :  { %2239 = vmatprep.subr.bf16.mxu0 %v3150_v59 }
 0x1c8   :  { %2240 = vmatpush1.bf16.msra.mxu0 %v3148_v58 }
 0x1c9   :  { %1324 = vmatpush1.bf16.msra.mxu1 %v3115_v60  ;;  %v3153_v60 = vld [vmem:[%s4401_s10 + $0x74] ss:$28 sps:$4 sm:$0xff]  }
 0x1ca   :  { %1325 = vmatprep.subr.bf16.mxu1 %v3120_v61  ;;  %v3151_v61 = vld [vmem:[%s4401_s10 + $0x70] ss:$28 sps:$4 sm:$0xff]  }
 0x1cd   :  { %1326 = vmatpush1.bf16.msra.mxu1 %v3118_v62  ;;  %v3156_v62 = vld [vmem:[%s4401_s10 + $0x7c] ss:$28 sps:$4 sm:$0xff]  }
 0x1ce   :  { %1327 = vmatprep.subr.bf16.mxu1 %v3123_v63  ;;  %v3154_v63 = vld [vmem:[%s4401_s10 + $0x78] ss:$28 sps:$4 sm:$0xff]   ;;  %2241 = vmatprep.subr.bf16.mxu0 %v3156_v62 }
 0x1cf   :  { %2242 = vmatpush1.bf16.msra.mxu0 %v3154_v63 }
 0x1d1   :  { %1328 = vmatpush1.bf16.msra.mxu1 %v3121_v0  ;;  %v3159_v0 = vld [vmem:[%s4401_s10 + $0xac] ss:$28 sps:$4 sm:$0xff]  }
 0x1d2   :  { %1329 = vmatprep.subr.bf16.mxu1 %v3126_v1  ;;  %v3162_v1 = vld [vmem:[%s4401_s10 + $0xb4] ss:$28 sps:$4 sm:$0xff]  }
 0x1d3   :  { %2243 = vmatprep.subr.bf16.mxu0 %v3162_v1 }
 0x1d5   :  { %1330 = vmatpush1.bf16.msra.mxu1 %v3124_v2  ;;  %v3157_v2 = vld [vmem:[%s4401_s10 + $0xa8] ss:$28 sps:$4 sm:$0xff]  }
 0x1d6   :  { %1331 = vmatprep.subr.bf16.mxu1 %v3129_v3  ;;  %v3160_v3 = vld [vmem:[%s4401_s10 + $0xb0] ss:$28 sps:$4 sm:$0xff]  }
 0x1d7   :  { %2244 = vmatpush1.bf16.msra.mxu0 %v3160_v3 }
 0x1d9   :  { %1332 = vmatpush1.bf16.msra.mxu1 %v3127_v4  ;;  %v3165_v4 = vld [vmem:[%s4401_s10 + $0xe4] ss:$28 sps:$4 sm:$0xff]  }
 0x1da   :  { %1333 = vmatprep.subr.bf16.mxu1 %v3132_v5  ;;  %v3168_v5 = vld [vmem:[%s4401_s10 + $0xec] ss:$28 sps:$4 sm:$0xff]  }
 0x1db   :  { %2245 = vmatprep.subr.bf16.mxu0 %v3168_v5 }
 0x1dc   :  { %2246 = vmatpush1.bf16.msra.mxu0 %v3166_v7 }
 0x1dd   :  { %1334 = vmatpush1.bf16.msra.mxu1 %v3130_v6  ;;  %v3163_v6 = vld [vmem:[%s4401_s10 + $0xe0] ss:$28 sps:$4 sm:$0xff]  }
 0x1de   :  { %1404 = vmatprep.subr.bf16.mxu1 %v3135_v23  ;;  %v3192_v23 = vld [vmem:[%s4401_s10 + $0x1cc] ss:$28 sps:$4 sm:$0xff]  }
 0x273   :  { %v1088_v10 = vpop.f32.mrb[4].mxu1 }
 0x274   :  { %v1089_v11 = vadd.f32 %v1088_v10, %v887_v8  ;;  %v1090_v12 = vpop.f32.mrb[5].mxu1  ;;  %v3171_v8 = vld [vmem:[%s4401_s10 + $0x11c] ss:$28 sps:$4 sm:$0xff]  }
 0x275   :  { %v1091_v13 = vadd.f32 %v1090_v12, %v891_v9  ;;  %v1092_v14 = vpop.f32.mrb[6].mxu1  ;;  %v3174_v9 = vld [vmem:[%s4401_s10 + $0x124] ss:$28 sps:$4 sm:$0xff]   ;;  %v3169_v10 = vld [vmem:[%s4401_s10 + $0x118] ss:$28 sps:$4 sm:$0xff]  }
 0x276   :  { %v1095_v15 = vmax.f32 %v1089_v11, 0.0  ;;  %v1093_v16 = vpop.f32.mrb[7].mxu1  ;;  %v3172_v11 = vld [vmem:[%s4401_s10 + $0x120] ss:$28 sps:$4 sm:$0xff]   ;;  %v3177_v12 = vld [vmem:[%s4401_s10 + $0x154] ss:$28 sps:$4 sm:$0xff]   ;;  %2247 = vmatprep.subr.bf16.mxu0 %v3174_v9 }
 0x277   :  { %v1096_v17 = vmax.f32 %v1091_v13, 0.0  ;;  %v3180_v13 = vld [vmem:[%s4401_s10 + $0x15c] ss:$28 sps:$4 sm:$0xff]   ;;  %v3175_v14 = vld [vmem:[%s4401_s10 + $0x150] ss:$28 sps:$4 sm:$0xff]   ;;  %2248 = vmatpush1.bf16.msra.mxu0 %v3172_v11 }
 0x278   :  { %v1097_v19 = vpack.c.bf16 %v1095_v15, %v1095_v15  ;;  %v3178_v15 = vld [vmem:[%s4401_s10 + $0x158] ss:$28 sps:$4 sm:$0xff]   ;;  %v3183_v16 = vld [vmem:[%s4401_s10 + $0x18c] ss:$28 sps:$4 sm:$0xff]   ;;  %2249 = vmatprep.subr.bf16.mxu0 %v3180_v13 }
 0x279   :  { %v1098_v18 = vpack.c.bf16 %v1096_v17, %v1096_v17  ;;  %v3186_v17 = vld [vmem:[%s4401_s10 + $0x194] ss:$28 sps:$4 sm:$0xff]  }
 0x27a   :  { %v3239_v11 = vld [vmem:[%s4401_s10 + $0x18] ss:$28 sps:$4 sm:$0xff]   ;;  %v3243_v13 = vld [vmem:[%s4401_s10 + $0x210] ss:$28 sps:$4 sm:$0xff]  }
 0x27b   :  { %1335 = vmatprep.mubr.bf16.mxu1 %v1098_v18  ;;  %v3181_v18 = vld [vmem:[%s4401_s10 + $0x188] ss:$28 sps:$4 sm:$0xff]   ;;  %2250 = vmatpush1.bf16.msra.mxu0 %v3178_v15  ;;  %v3244_v15 = vld [vmem:[%s4401_s10 + $0x50] ss:$28 sps:$4 sm:$0xff]  }
 0x27c   :  { %1336 = vmatmul.mubr.bf16.vlgmr.msra.gmra.mrb[8].mxu1 %v1097_v19  ;;  %v3184_v19 = vld [vmem:[%s4401_s10 + $0x190] ss:$28 sps:$4 sm:$0xff]   ;;  %2251 = vmatprep.subr.bf16.mxu0 %v3186_v17  ;;  %v3248_v17 = vld [vmem:[%s4401_s10 + $0x248] ss:$28 sps:$4 sm:$0xff]  }
 0x27d   :  { %1436 = vmatprep.mubr.bf16.mxu1 %v3333_v41  ;;  %1405 = vmatpush1.bf16.msra.mxu1 %v3133_v20  ;;  %v1131_v41 = vld [vmem:[%s4399_s7] sm:$0x3] }
 0x27e   :  { %1406 = vmatprep.subr.bf16.mxu1 %v3138_v25  ;;  %v1140_v27 = vrot.slane %v1131_v41, %v3827_v24  ;;  %v1136_v36 = vrot.slane %v1131_v41, %v3821_v22  ;;  %v3189_v20 = vld [vmem:[%s4401_s10 + $0x1c4] ss:$28 sps:$4 sm:$0xff]   ;;  %v3195_v41 = vld [vmem:[%s4401_s10 + $0x1fc] ss:$28 sps:$4 sm:$0xff]  }
 0x27f   :  { %v3187_v25 = vld [vmem:[%s4401_s10 + $0x1c0] ss:$28 sps:$4 sm:$0xff]   ;;  %2252 = vmatpush1.bf16.msra.mxu0 %v3184_v19  ;;  %v3249_v19 = vld [vmem:[%s4401_s10 + $0x88] ss:$28 sps:$4 sm:$0xff]  }
 0x280   :  { %2253 = vmatprep.subr.bf16.mxu0 %v3192_v23  ;;  %v3253_v23 = vld [vmem:[%s4401_s10 + $0x280] ss:$28 sps:$4 sm:$0xff]  }
 0x281   :  { %1407 = vmatpush1.bf16.msra.mxu1 %v3136_v26  ;;  %v3190_v26 = vld [vmem:[%s4401_s10 + $0x1c8] ss:$28 sps:$4 sm:$0xff]  }
 0x282   :  { %2194 = vmatprep.subr.bf16.mxu1 %v3141_v53  ;;  %v3229_v53 = vld [vmem:[%s4401_s10 + $0x348] ss:$28 sps:$4 sm:$0xff]  }
 0x283   :  { %2254 = vmatpush1.bf16.msra.mxu0 %v3190_v26  ;;  %v3254_v26 = vld [vmem:[%s4401_s10 + $0xc0] ss:$28 sps:$4 sm:$0xff]  }
 0x34f   :  { %v1337_v28 = vpop.f32.mrb[8].mxu1 }
 0x350   :  { %v1339_v29 = vpop.f32.mrb[9].mxu1  ;;  %v1338_v37 = vadd.f32 %v1337_v28, %v1136_v36  ;;  %v3193_v28 = vld [vmem:[%s4401_s10 + $0x1f8] ss:$28 sps:$4 sm:$0xff]  }
 0x351   :  { %v1340_v30 = vadd.f32 %v1339_v29, %v1140_v27  ;;  %v1341_v31 = vpop.f32.mrb[10].mxu1  ;;  %v3198_v27 = vld [vmem:[%s4401_s10 + $0x204] ss:$28 sps:$4 sm:$0xff]   ;;  %v3210_v36 = vld [vmem:[%s4401_s10 + $0x274] ss:$28 sps:$4 sm:$0xff]  }
 0x352   :  { %v1342_v32 = vpop.f32.mrb[11].mxu1  ;;  %v1348_v42 = vmul.f32 %v1338_v37, %v1338_v37  ;;  %v3196_v29 = vld [vmem:[%s4401_s10 + $0x200] ss:$28 sps:$4 sm:$0xff]   ;;  %2255 = vmatprep.subr.bf16.mxu0 %v3198_v27  ;;  %v3258_v27 = vld [vmem:[%s4401_s10 + $0x2b8] ss:$28 sps:$4 sm:$0xff]  }
 0x353   :  { %v1344_v33 = vmul.f32 0.5, %v1340_v30  ;;  %v3204_v31 = vld [vmem:[%s4401_s10 + $0x23c] ss:$28 sps:$4 sm:$0xff]   ;;  %v3199_v32 = vld [vmem:[%s4401_s10 + $0x230] ss:$28 sps:$4 sm:$0xff]   ;;  %2256 = vmatpush1.bf16.msra.mxu0 %v3196_v29 }
 0x354   :  { %2257 = vmatprep.subr.bf16.mxu0 %v3204_v31  ;;  %v3259_v29 = vld [vmem:[%s4401_s10 + $0xf8] ss:$28 sps:$4 sm:$0xff]   ;;  %v3263_v31 = vld [vmem:[%s4401_s10 + $0x2f0] ss:$28 sps:$4 sm:$0xff]  }
 0x355   :  { %v1345_v34 = vmul.f32 1.442695, %v1344_v33  ;;  %v3202_v33 = vld [vmem:[%s4401_s10 + $0x238] ss:$28 sps:$4 sm:$0xff]  }
 0x357   :  { %3299 = vpow2.f32 %v1345_v34  ;;  %v3207_v34 = vld [vmem:[%s4401_s10 + $0x26c] ss:$28 sps:$4 sm:$0xff]   ;;  %2258 = vmatpush1.bf16.msra.mxu0 %v3202_v33 }
 0x358   :  { %2259 = vmatprep.subr.bf16.mxu0 %v3210_v36  ;;  %v3264_v33 = vld [vmem:[%s4401_s10 + $0x130] ss:$28 sps:$4 sm:$0xff]   ;;  %v3268_v36 = vld [vmem:[%s4401_s10 + $0x328] ss:$28 sps:$4 sm:$0xff]  }
 0x361   :  { %v3300_v40 = vpop.eup %3299 }
 0x362   :  { %v1358_v43 = vmul.f32 %v3300_v40, %v1357_v38  ;;  %v1362_v44 = vmul.f32 %v3300_v40, %v2730_v39  ;;  %v1347_v35 = vmul.f32 %v3300_v40, %v3300_v40  ;;  %v3208_v38 = vld [vmem:[%s4401_s10 + $0x270] ss:$28 sps:$4 sm:$0xff]   ;;  %v3213_v39 = vld [vmem:[%s4401_s10 + $0x2a4] ss:$28 sps:$4 sm:$0xff]  }
 0x363   :  { %v3216_v40 = vld [vmem:[%s4401_s10 + $0x2ac] ss:$28 sps:$4 sm:$0xff]   ;;  %2260 = vmatpush1.bf16.msra.mxu0 %v3208_v38 }
 0x364   :  { %v1359_v45 = vadd.f32 %v1358_v43, %v1338_v37  ;;  %v1363_v46 = vadd.f32 %v1362_v44, %v1338_v37  ;;  %v1349_v47 = vadd.f32 %v1348_v42, %v1347_v35  ;;  %v3205_v37 = vld [vmem:[%s4401_s10 + $0x268] ss:$28 sps:$4 sm:$0xff]   ;;  %v3211_v42 = vld [vmem:[%s4401_s10 + $0x2a0] ss:$28 sps:$4 sm:$0xff]   ;;  %2261 = vmatprep.subr.bf16.mxu0 %v3216_v40 }
 0x365   :  { %v3214_v43 = vld [vmem:[%s4401_s10 + $0x2a8] ss:$28 sps:$4 sm:$0xff]   ;;  %v3219_v44 = vld [vmem:[%s4401_s10 + $0x2dc] ss:$28 sps:$4 sm:$0xff]  }
 0x366   :  { %v1364_v48 = vpack.c.bf16 %v1363_v46, %v1359_v45  ;;  %v2729_v49 = vadd.f32 -1.0, %v1349_v47  ;;  %v3222_v35 = vld [vmem:[%s4401_s10 + $0x2e4] ss:$28 sps:$4 sm:$0xff]   ;;  %v3217_v45 = vld [vmem:[%s4401_s10 + $0x2d8] ss:$28 sps:$4 sm:$0xff]  }
 0x367   :  { %v3220_v46 = vld [vmem:[%s4401_s10 + $0x2e0] ss:$28 sps:$4 sm:$0xff]   ;;  %2262 = vmatpush1.bf16.msra.mxu0 %v3214_v43  ;;  %v3225_v47 = vld [vmem:[%s4401_s10 + $0x314] ss:$28 sps:$4 sm:$0xff]   ;;  %v3269_v38 = vld [vmem:[%s4401_s10 + $0x168] ss:$28 sps:$4 sm:$0xff]  }
 0x368   :  { %2735 = vmatmul.mubr.msk.bf16.vlgmr.msra.gmra.mrb[12].mxu1 %vm1352_vm1, %v1364_v48  ;;  %v1351_v50 = vsub.f32 %v2729_v49, %v1340_v30  ;;  %v3201_v30 = vld [vmem:[%s4401_s10 + $0x234] ss:$28 sps:$4 sm:$0xff]   ;;  %2263 = vmatprep.subr.bf16.mxu0 %v3222_v35  ;;  %v3228_v48 = vld [vmem:[%s4401_s10 + $0x31c] ss:$28 sps:$4 sm:$0xff]  }
 0x369   :  { %2195 = vmatpush1.bf16.msra.mxu1 %v3139_v52  ;;  %v3223_v49 = vld [vmem:[%s4401_s10 + $0x310] ss:$28 sps:$4 sm:$0xff]   ;;  %v3273_v40 = vld [vmem:[%s4401_s10 + $0x360] ss:$28 sps:$4 sm:$0xff]  }
 0x36a   :  { %v1353_v51 = vsel %vm1352_vm1, %v1351_v50, 0.0  ;;  %2196 = vmatprep.subr.bf16.mxu1 %v3147_v57  ;;  %v3226_v50 = vld [vmem:[%s4401_s10 + $0x318] ss:$28 sps:$4 sm:$0xff]   ;;  %v1369_v57 = vld [vmem:[%s4402_s9] sm:$0x3] }
 0x36b   :  { %1354 = vadd.xlane.f32.xlu0 %v1353_v51  ;;  %2264 = vmatpush1.bf16.msra.mxu0 %v3220_v46  ;;  %v3231_v51 = vld [vmem:[%s4401_s10 + $0x34c] ss:$28 sps:$4 sm:$0xff]   ;;  %v3234_v52 = vld [vmem:[%s4401_s10 + $0x354] ss:$28 sps:$4 sm:$0xff]   ;;  %v1374_v58 = vrot.slane %v1369_v57, %v3821_v22  ;;  %v1378_v59 = vrot.slane %v1369_v57, %v3827_v24  ;;  %v3274_v43 = vld [vmem:[%s4401_s10 + $0x1a0] ss:$28 sps:$4 sm:$0xff]  }
 0x36c   :  { %2265 = vmatprep.subr.bf16.mxu0 %v3228_v48  ;;  %v3275_v35 = vld [vmem:[%s4401_s10 + $0x1d0] ss:$28 sps:$4 sm:$0xff]   ;;  %v3278_v46 = vld [vmem:[%s4401_s10 + $0x208] ss:$28 sps:$4 sm:$0xff]   ;;  %v3281_v48 = vld [vmem:[%s4401_s10 + $0x240] ss:$28 sps:$4 sm:$0xff]  }
 0x36d   :  { %2197 = vmatpush1.bf16.msra.mxu1 %v3145_v56  ;;  %v3238_v56 = vld [vmem:[%s4401_s10 + $0x1d8] ss:$28 sps:$4 sm:$0xff]  }
 0x36e   :  { %2198 = vmatprep.subr.bf16.mxu1 %v3153_v60  ;;  %v3298_v57 = vld [vmem:[%s4401_s10 + $0x35c] ss:$28 sps:$4 sm:$0xff]  }
 0x36f   :  { %2266 = vmatpush1.bf16.msra.mxu0 %v3226_v50  ;;  %v3284_v50 = vld [vmem:[%s4401_s10 + $0x278] ss:$28 sps:$4 sm:$0xff]  }
 0x370   :  { %2267 = vmatprep.subr.bf16.mxu0 %v3234_v52  ;;  %v3287_v52 = vld [vmem:[%s4401_s10 + $0x2b0] ss:$28 sps:$4 sm:$0xff]  }
 0x371   :  { %2199 = vmatpush1.bf16.msra.mxu1 %v3151_v61 }
 0x372   :  { %2200 = vmatprep.subr.bf16.mxu1 %v3159_v0 }
 0x373   :  { %2268 = vmatpush1.bf16.msra.mxu0 %v3232_v54  ;;  %v3290_v54 = vld [vmem:[%s4401_s10 + $0x2e8] ss:$28 sps:$4 sm:$0xff]  }
 0x374   :  { %2848 = vmatprep.subr.bf16.mxu0 %v3238_v56  ;;  %v3293_v56 = vld [vmem:[%s4401_s10 + $0x320] ss:$28 sps:$4 sm:$0xff]  }
 0x375   :  { %2201 = vmatpush1.bf16.msra.mxu1 %v3157_v2 }
 0x376   :  { %2202 = vmatprep.subr.bf16.mxu1 %v3165_v4 }
 0x379   :  { %2203 = vmatpush1.bf16.msra.mxu1 %v3163_v6 }
 0x37a   :  { %2204 = vmatprep.subr.bf16.mxu1 %v3171_v8 }
 0x37d   :  { %2205 = vmatpush1.bf16.msra.mxu1 %v3169_v10  ;;  %v3235_v10 = vld [vmem:[%s4401_s10 + $0x10] ss:$28 sps:$4 sm:$0xff]  }
 0x37e   :  { %2206 = vmatprep.subr.bf16.mxu1 %v3177_v12  ;;  %v3242_v12 = vld [vmem:[%s4401_s10 + $0x4c] ss:$28 sps:$4 sm:$0xff]  }
 0x381   :  { %2207 = vmatpush1.bf16.msra.mxu1 %v3175_v14  ;;  %v3240_v14 = vld [vmem:[%s4401_s10 + $0x48] ss:$28 sps:$4 sm:$0xff]  }
 0x382   :  { %2208 = vmatprep.subr.bf16.mxu1 %v3183_v16  ;;  %v3247_v16 = vld [vmem:[%s4401_s10 + $0x84] ss:$28 sps:$4 sm:$0xff]  }
 0x385   :  { %2209 = vmatpush1.bf16.msra.mxu1 %v3181_v18  ;;  %v3245_v18 = vld [vmem:[%s4401_s10 + $0x80] ss:$28 sps:$4 sm:$0xff]  }
 0x386   :  { %2210 = vmatprep.subr.bf16.mxu1 %v3189_v20  ;;  %v3252_v20 = vld [vmem:[%s4401_s10 + $0xbc] ss:$28 sps:$4 sm:$0xff]  }
 0x389   :  { %2211 = vmatpush1.bf16.msra.mxu1 %v3187_v25  ;;  %v3250_v25 = vld [vmem:[%s4401_s10 + $0xb8] ss:$28 sps:$4 sm:$0xff]  }
 0x38a   :  { %2212 = vmatprep.subr.bf16.mxu1 %v3195_v41  ;;  %v3257_v41 = vld [vmem:[%s4401_s10 + $0xf4] ss:$28 sps:$4 sm:$0xff]  }
 0x38d   :  { %2213 = vmatpush1.bf16.msra.mxu1 %v3193_v28  ;;  %v3255_v28 = vld [vmem:[%s4401_s10 + $0xf0] ss:$28 sps:$4 sm:$0xff]  }
 0x38e   :  { %2214 = vmatprep.subr.bf16.mxu1 %v3201_v30  ;;  %v3262_v30 = vld [vmem:[%s4401_s10 + $0x12c] ss:$28 sps:$4 sm:$0xff]  }
 0x391   :  { %2215 = vmatpush1.bf16.msra.mxu1 %v3199_v32  ;;  %v3260_v32 = vld [vmem:[%s4401_s10 + $0x128] ss:$28 sps:$4 sm:$0xff]  }
 0x392   :  { %2216 = vmatprep.subr.bf16.mxu1 %v3207_v34  ;;  %v3267_v34 = vld [vmem:[%s4401_s10 + $0x164] ss:$28 sps:$4 sm:$0xff]  }
 0x395   :  { %2217 = vmatpush1.bf16.msra.mxu1 %v3205_v37  ;;  %v3265_v37 = vld [vmem:[%s4401_s10 + $0x160] ss:$28 sps:$4 sm:$0xff]  }
 0x396   :  { %2218 = vmatprep.subr.bf16.mxu1 %v3213_v39  ;;  %v3272_v39 = vld [vmem:[%s4401_s10 + $0x19c] ss:$28 sps:$4 sm:$0xff]  }
 0x399   :  { %2219 = vmatpush1.bf16.msra.mxu1 %v3211_v42  ;;  %v3270_v42 = vld [vmem:[%s4401_s10 + $0x198] ss:$28 sps:$4 sm:$0xff]  }
 0x39a   :  { %2220 = vmatprep.subr.bf16.mxu1 %v3219_v44  ;;  %v3277_v44 = vld [vmem:[%s4401_s10 + $0x1d4] ss:$28 sps:$4 sm:$0xff]  }
 0x39d   :  { %2221 = vmatpush1.bf16.msra.mxu1 %v3217_v45  ;;  %v3280_v45 = vld [vmem:[%s4401_s10 + $0x20c] ss:$28 sps:$4 sm:$0xff]  }
 0x39e   :  { %2222 = vmatprep.subr.bf16.mxu1 %v3225_v47  ;;  %v3283_v47 = vld [vmem:[%s4401_s10 + $0x244] ss:$28 sps:$4 sm:$0xff]  }
 0x3a1   :  { %2223 = vmatpush1.bf16.msra.mxu1 %v3223_v49  ;;  %v3286_v49 = vld [vmem:[%s4401_s10 + $0x27c] ss:$28 sps:$4 sm:$0xff]  }
 0x3a2   :  { %2224 = vmatprep.subr.bf16.mxu1 %v3231_v51  ;;  %v3289_v51 = vld [vmem:[%s4401_s10 + $0x2b4] ss:$28 sps:$4 sm:$0xff]  }
 0x3a5   :  { %2225 = vmatpush1.bf16.msra.mxu1 %v3229_v53  ;;  %v3292_v53 = vld [vmem:[%s4401_s10 + $0x2ec] ss:$28 sps:$4 sm:$0xff]  }
 0x3a6   :  { %2280 = vmatprep.subr.bf16.mxu1 %v3237_v55  ;;  %v3295_v55 = vld [vmem:[%s4401_s10 + $0x324] ss:$28 sps:$4 sm:$0xff]  }
 0x43b   :  { %v1438_v60 = vpop.f32.mrb[12].mxu1 }
 0x43c   :  { %v1439_v61 = vadd.f32 %v1438_v60, %v1374_v58  ;;  %v1440_v62 = vpop.f32.mrb[13].mxu1  ;;  %v4304_v60 = vld [vmem:[%s4403_s11] sm:$0x7f] }
 0x43d   :  { %v1441_v63 = vadd.f32 %v1440_v62, %v1378_v59  ;;  %v1442_v0 = vpop.f32.mrb[14].mxu1  ;;  %v1586_v62 = vrot.slane %v4304_v60, %v3821_v22 }
 0x43e   :  { %v1443_v1 = vadd.f32 %v1442_v0, %v1374_v58  ;;  %v1444_v2 = vpop.f32.mrb[15].mxu1  ;;  %v1447_v4 = vmax.f32 %v1439_v61, 0.0  ;;  %v3296_v58 = vld [vmem:[%s4401_s10 + $0x358] ss:$28 sps:$4 sm:$0xff]   ;;  %v1597_v61 = vsub.s32 3, %v3818_v21  ;;  %v1590_v0 = vrot.slane %v4304_v60, %v3827_v24 }
 0x43f   :  { %v1445_v3 = vadd.f32 %v1444_v2, %v1378_v59  ;;  %v1448_v6 = vmax.f32 %v1441_v63, 0.0  ;;  %v1593_v59 = vsub.s32 2, %v3818_v21 }
 0x440   :  { %v1449_v5 = vmax.f32 %v1443_v1, 0.0 }
 0x441   :  { %v1450_v7 = vmax.f32 %v1445_v3, 0.0  ;;  %v1594_v63 = vrot.slane %v4304_v60, %v1593_v59  ;;  %v1598_v3 = vrot.slane %v4304_v60, %v1597_v61  ;;  %v3330_v59 = vld [vmem:[%s4393_s0 + $0x8] sm:$0xff] }
 0x442   :  { %v4156_v8 = vpack.c.bf16 %v1449_v5, %v1447_v4  ;;  %v49_v61 = vunpack.c.l.bf16 %v3330_v59 }
 0x443   :  { %v1452_v9 = vpack.c.bf16 %v1450_v7, %v1448_v6 }
 0x445   :  { %2226 = vmatprep.mubr.bf16.mxu1 %v1452_v9  ;;  %2269 = vmatprep.mubr.bf16.mxu0 %v1452_v9 }
 0x446   :  { %2227 = vmatmul.mubr.bf16.vlgmr.msra.gmra.mrb[16].mxu1 %v4156_v8  ;;  %2270 = vmatmul.mubr.bf16.vlgmr.msra.gmra.mrb[4].mxu0 %v4156_v8 }
 0x447   :  { %2281 = vmatpush1.bf16.msra.mxu1 %v3235_v10  ;;  %2849 = vmatpush3.bf16.msra.mxu0 %v3239_v11 }
 0x448   :  { %2312 = vmatprep.mubr.bf16.mxu1 %v1452_v9  ;;  %2355 = vmatprep.mubr.bf16.mxu0 %v1452_v9 }
 0x449   :  { %2282 = vmatprep.subr.bf16.mxu1 %v3242_v12  ;;  %2850 = vmatprep.subr.bf16.mxu0 %v3243_v13 }
 0x44b   :  { %2283 = vmatpush1.bf16.msra.mxu1 %v3240_v14  ;;  %2851 = vmatpush3.bf16.msra.mxu0 %v3244_v15 }
 0x44c   :  { %2284 = vmatprep.subr.bf16.mxu1 %v3247_v16  ;;  %2852 = vmatprep.subr.bf16.mxu0 %v3248_v17 }
 0x44f   :  { %2285 = vmatpush1.bf16.msra.mxu1 %v3245_v18  ;;  %2853 = vmatpush3.bf16.msra.mxu0 %v3249_v19 }
 0x450   :  { %2286 = vmatprep.subr.bf16.mxu1 %v3252_v20  ;;  %2854 = vmatprep.subr.bf16.mxu0 %v3253_v23 }
 0x453   :  { %2287 = vmatpush1.bf16.msra.mxu1 %v3250_v25  ;;  %2855 = vmatpush3.bf16.msra.mxu0 %v3254_v26 }
 0x454   :  { %2288 = vmatprep.subr.bf16.mxu1 %v3257_v41  ;;  %2856 = vmatprep.subr.bf16.mxu0 %v3258_v27 }
 0x457   :  { %2289 = vmatpush1.bf16.msra.mxu1 %v3255_v28  ;;  %2857 = vmatpush3.bf16.msra.mxu0 %v3259_v29 }
 0x458   :  { %2290 = vmatprep.subr.bf16.mxu1 %v3262_v30  ;;  %2858 = vmatprep.subr.bf16.mxu0 %v3263_v31 }
 0x45b   :  { %2291 = vmatpush1.bf16.msra.mxu1 %v3260_v32  ;;  %2859 = vmatpush3.bf16.msra.mxu0 %v3264_v33 }
 0x45c   :  { %2292 = vmatprep.subr.bf16.mxu1 %v3267_v34  ;;  %2860 = vmatprep.subr.bf16.mxu0 %v3268_v36 }
 0x45f   :  { %2293 = vmatpush1.bf16.msra.mxu1 %v3265_v37  ;;  %2861 = vmatpush3.bf16.msra.mxu0 %v3269_v38 }
 0x460   :  { %2294 = vmatprep.subr.bf16.mxu1 %v3272_v39  ;;  %2862 = vmatprep.subr.bf16.mxu0 %v3273_v40 }
 0x463   :  { %2295 = vmatpush1.bf16.msra.mxu1 %v3270_v42  ;;  %2863 = vmatpush3.bf16.msra.mxu0 %v3274_v43 }
 0x464   :  { %2296 = vmatprep.subr.bf16.mxu1 %v3277_v44 }
 0x466   :  { %2356 = vmatmul.mubr.bf16.vlgmr.msra.gmra.mrb[8].mxu0 %v4156_v8 }
 0x467   :  { %2297 = vmatpush1.bf16.msra.mxu1 %v3275_v35 }
 0x468   :  { %2298 = vmatprep.subr.bf16.mxu1 %v3280_v45 }
 0x46b   :  { %2299 = vmatpush1.bf16.msra.mxu1 %v3278_v46  ;;  %v1609_v46 = vsub.s32 6, %v3818_v21 }
 0x46c   :  { %2300 = vmatprep.subr.bf16.mxu1 %v3283_v47 }
 0x46f   :  { %2301 = vmatpush1.bf16.msra.mxu1 %v3281_v48 }
 0x470   :  { %2302 = vmatprep.subr.bf16.mxu1 %v3286_v49 }
 0x473   :  { %2303 = vmatpush1.bf16.msra.mxu1 %v3284_v50 }
 0x474   :  { %2304 = vmatprep.subr.bf16.mxu1 %v3289_v51 }
 0x477   :  { %2305 = vmatpush1.bf16.msra.mxu1 %v3287_v52 }
 0x478   :  { %2306 = vmatprep.subr.bf16.mxu1 %v3292_v53  ;;  %v1610_v53 = vrot.slane %v4304_v60, %v1609_v46 }
 0x47b   :  { %2307 = vmatpush1.bf16.msra.mxu1 %v3290_v54 }
 0x47c   :  { %2308 = vmatprep.subr.bf16.mxu1 %v3295_v55 }
 0x47f   :  { %2309 = vmatpush1.bf16.msra.mxu1 %v3293_v56 }
 0x480   :  { %2310 = vmatprep.subr.bf16.mxu1 %v3298_v57  ;;  %v3329_v57 = vld [vmem:[%s4393_s0] sm:$0xff] }
 0x483   :  { %2311 = vmatpush1.bf16.msra.mxu1 %v3296_v58  ;;  %v47_v58 = vunpack.c.l.bf16 %v3329_v57 }
 0x486   :  { %2313 = vmatmul.mubr.bf16.vlgmr.msra.gmra.mrb[20].mxu1 %v4156_v8 }
 0x519   :  { %v2228_v1 = vpop.f32.mrb[16].mxu1  ;;  %v2271_v2 = vpop.f32.mrb[4].mxu0 }
 0x51a   :  { %v2230_v4 = vpop.f32.mrb[17].mxu1  ;;  %v2273_v5 = vpop.f32.mrb[5].mxu0  ;;  %v4313_v6 = vadd.f32 %v2228_v1, %v1586_v62  ;;  %v4315_v7 = vadd.f32 %v2271_v2, %v1594_v63  ;;  %v50_v2 = vunpack.c.h.bf16 %v3330_v59 }
 0x51b   :  { %v2232_v8 = vpop.f32.mrb[18].mxu1  ;;  %v2275_v9 = vpop.f32.mrb[6].mxu0  ;;  %v4317_v10 = vadd.f32 %v2230_v4, %v1590_v0  ;;  %v4319_v11 = vadd.f32 %v2273_v5, %v1598_v3 }
 0x51c   :  { %v2234_v22 = vpop.f32.mrb[19].mxu1  ;;  %v2277_v12 = vpop.f32.mrb[7].mxu0  ;;  %v2364_v24 = vand.u32 2147483647, %v4313_v6  ;;  %v2366_v13 = vand.u32 2147483647, %v4315_v7  ;;  %v4323_v14 = vadd.f32 %v2232_v8, %v1586_v62  ;;  %v4326_v16 = vadd.f32 %v2275_v9, %v1594_v63 }
 0x51d   :  { %v2365_v15 = vand.u32 2147483647, %v4317_v10  ;;  %v4328_v17 = vadd.f32 %v2234_v22, %v1590_v0  ;;  %v4330_v18 = vadd.f32 %v2277_v12, %v1598_v3  ;;  %v2367_v19 = vand.u32 2147483647, %v4319_v11 }
 0x51e   :  { %v2371_v20 = vand.u32 2147483647, %v4323_v14  ;;  %v2373_v23 = vand.u32 2147483647, %v4326_v16  ;;  %v2378_v26 = vsub.f32 0.0, %v2364_v24  ;;  %v2380_v28 = vsub.f32 0.0, %v2366_v13 }
 0x51f   :  { %v2372_v25 = vand.u32 2147483647, %v4328_v17  ;;  %v2374_v27 = vand.u32 2147483647, %v4330_v18  ;;  %v2379_v29 = vsub.f32 0.0, %v2365_v15  ;;  %v2381_v32 = vsub.f32 0.0, %v2367_v19 }
 0x520   :  { %v2385_v41 = vsub.f32 0.0, %v2371_v20  ;;  %v2387_v30 = vsub.f32 0.0, %v2373_v23  ;;  %v48_v63 = vunpack.c.h.bf16 %v3329_v57  ;;  %v2462_v5 = vmax.f32 %v4313_v6, 0.0 }
 0x521   :  { %v2386_v31 = vsub.f32 0.0, %v2372_v25  ;;  %v2388_v34 = vsub.f32 0.0, %v2374_v27  ;;  %v2490_v8 = vmul.f32 %v4313_v6, %v47_v58  ;;  %v2464_v9 = vmax.f32 %v4315_v7, 0.0 }
 0x522   :  { %v2392_v33 = vpack.c.bf16 %v2385_v41, %v2378_v26  ;;  %v2394_v36 = vpack.c.bf16 %v2387_v30, %v2380_v28  ;;  %v2492_v22 = vmul.f32 %v4315_v7, %v49_v61  ;;  %v2463_v12 = vmax.f32 %v4317_v10, 0.0 }
 0x523   :  { %v2393_v37 = vpack.c.bf16 %v2386_v31, %v2379_v29  ;;  %v2395_v39 = vpack.c.bf16 %v2388_v34, %v2381_v32  ;;  %v2491_v24 = vmul.f32 %v4317_v10, %v48_v63  ;;  %v2465_v13 = vmax.f32 %v4319_v11, 0.0 }
 0x524   :  { %v2400_v38 = vmul.bf16 1069105081, %v2392_v33  ;;  %v2406_v40 = vmul.bf16 1069105081, %v2394_v36  ;;  %v2493_v20 = vmul.f32 %v4319_v11, %v50_v2  ;;  %v2469_v23 = vmax.f32 %v4323_v14, 0.0 }
 0x525   :  { %v2403_v42 = vmul.bf16 1069105081, %v2393_v37  ;;  %v2409_v43 = vmul.bf16 1069105081, %v2395_v39  ;;  %v2514_v25 = vmul.f32 %v4323_v14, %v47_v58  ;;  %v2471_v6 = vmax.f32 %v4326_v16, 0.0 }
 0x526   :  { %3301 = vpow.bf16 %v2400_v38  ;;  %v2516_v7 = vmul.f32 %v4326_v16, %v49_v61  ;;  %v2470_v30 = vmax.f32 %v4328_v17, 0.0  ;;  %v2515_v31 = vmul.f32 %v4328_v17, %v48_v63 }
 0x527   :  { %3303 = vpow.bf16 %v2406_v40  ;;  %v2472_v11 = vmax.f32 %v4330_v18, 0.0  ;;  %v2517_v16 = vmul.f32 %v4330_v18, %v50_v2 }
 0x528   :  { %3305 = vpow.bf16 %v2403_v42 }
 0x529   :  { %3307 = vpow.bf16 %v2409_v43 }
 0x531   :  { %v3302_v44 = vpop.eup %3301 }
 0x532   :  { %v3304_v35 = vpop.eup %3303  ;;  %v2420_v45 = vadd.bf16 1065369472, %v3302_v44 }
 0x533   :  { %v3306_v47 = vpop.eup %3305  ;;  %v2422_v48 = vadd.bf16 1065369472, %v3304_v35 }
 0x534   :  { %v3308_v49 = vpop.eup %3307  ;;  %3309 = vlog2.bf16 %v2420_v45  ;;  %v2421_v50 = vadd.bf16 1065369472, %v3306_v47 }
 0x535   :  { %3311 = vlog2.bf16 %v2422_v48  ;;  %v2423_v51 = vadd.bf16 1065369472, %v3308_v49 }
 0x536   :  { %3313 = vlog2.bf16 %v2421_v50 }
 0x537   :  { %3315 = vlog2.bf16 %v2423_v51 }
 0x539   :  { %v2864_v52 = vpop.f32.mrb[8].mxu0 }
 0x53a   :  { %v2865_v54 = vpop.f32.mrb[9].mxu0 }
 0x53b   :  { %v2866_v55 = vadd.f32 %v2865_v54, %v2864_v52  ;;  %v2867_v56 = vpop.f32.mrb[10].mxu0 }
 0x53c   :  { %v2868_v62 = vpop.f32.mrb[11].mxu0 }
 0x53d   :  { %v4345_v0 = vadd.f32 %v2866_v55, %v1610_v53  ;;  %v2869_v1 = vadd.f32 %v2868_v62, %v2867_v56 }
 0x53f   :  { %v2370_v3 = vand.u32 2147483647, %v4345_v0  ;;  %v4348_v4 = vadd.f32 %v2869_v1, %v1610_v53  ;;  %v3310_v19 = vpop.eup %3309 }
 0x540   :  { %v3312_v26 = vpop.eup %3311  ;;  %v2429_v41 = vmul.bf16 1060192049, %v3310_v19 }
 0x541   :  { %v2377_v15 = vand.u32 2147483647, %v4348_v4  ;;  %v2384_v27 = vsub.f32 0.0, %v2370_v3  ;;  %v3314_v10 = vpop.eup %3313  ;;  %v2435_v29 = vmul.bf16 1060192049, %v3312_v26  ;;  %v1601_v3 = vsub.s32 4, %v3818_v21 }
 0x542   :  { %v3316_v32 = vpop.eup %3315  ;;  %v2448_v33 = vunpack.c.l.bf16 %v2429_v41  ;;  %v2455_v34 = vunpack.c.h.bf16 %v2429_v41  ;;  %v2432_v14 = vmul.bf16 1060192049, %v3314_v10 }
 0x543   :  { %v2391_v28 = vsub.f32 0.0, %v2377_v15  ;;  %v2450_v37 = vunpack.c.l.bf16 %v2435_v29  ;;  %v2457_v38 = vunpack.c.h.bf16 %v2435_v29  ;;  %v2438_v39 = vmul.bf16 1060192049, %v3316_v32  ;;  %v3331_v32 = vld [vmem:[%s4393_s0 + $0x18] sm:$0xf] }
 0x544   :  { %v2476_v40 = vadd.f32 %v2462_v5, %v2448_v33  ;;  %v2483_v42 = vadd.f32 %v2469_v23, %v2455_v34  ;;  %v2449_v43 = vunpack.c.l.bf16 %v2432_v14  ;;  %v2456_v44 = vunpack.c.h.bf16 %v2432_v14 }
 0x545   :  { %v2398_v36 = vpack.c.bf16 %v2391_v28, %v2384_v27  ;;  %v2485_v35 = vadd.f32 %v2471_v6, %v2457_v38  ;;  %v2451_v45 = vunpack.c.l.bf16 %v2438_v39  ;;  %v2458_v46 = vunpack.c.h.bf16 %v2438_v39 }
 0x546   :  { %v2521_v47 = vsub.f32 %v2483_v42, %v2514_v25  ;;  %v2477_v48 = vadd.f32 %v2463_v12, %v2449_v43  ;;  %v2484_v49 = vadd.f32 %v2470_v30, %v2456_v44  ;;  %v2478_v50 = vadd.f32 %v2464_v9, %v2450_v37 }
 0x547   :  { %v2418_v17 = vmul.bf16 1069105081, %v2398_v36  ;;  %v2523_v51 = vsub.f32 %v2485_v35, %v2516_v7  ;;  %v2486_v52 = vadd.f32 %v2472_v11, %v2458_v46  ;;  %v2479_v53 = vadd.f32 %v2465_v13, %v2451_v45 }
 0x548   :  { %v2522_v54 = vsub.f32 %v2484_v49, %v2515_v31  ;;  %v2497_v55 = vsub.f32 %v2476_v40, %v2490_v8  ;;  %v2498_v56 = vsub.f32 %v2477_v48, %v2491_v24  ;;  %v2499_v18 = vsub.f32 %v2478_v50, %v2492_v22  ;;  %v3332_v50 = vld [vmem:[%s4393_s0 + $0x10] sm:$0xff] }
 0x549   :  { %3317 = vpow.bf16 %v2418_v17  ;;  %v2524_v57 = vsub.f32 %v2486_v52, %v2517_v16  ;;  %v2500_v58 = vsub.f32 %v2479_v53, %v2493_v20  ;;  %v1605_v5 = vsub.s32 5, %v3818_v21 }
 0x54a   :  { %v2528_v59 = vadd.f32 %v2522_v54, %v2521_v47  ;;  %v2504_v61 = vadd.f32 %v2498_v56, %v2497_v55  ;;  %v1602_v12 = vrot.slane %v4304_v60, %v1601_v3  ;;  %v53_v33 = vunpack.c.l.bf16 %v3331_v32 }
 0x54b   :  { %v1606_v22 = vrot.slane %v4304_v60, %v1605_v5  ;;  %v2468_v14 = vmax.f32 %v4345_v0, 0.0  ;;  %v2475_v38 = vmax.f32 %v4348_v4, 0.0 }
 0x54c   :  { %v2529_v62 = vadd.f32 %v2528_v59, %v2523_v51  ;;  %v2505_v63 = vadd.f32 %v2504_v61, %v2499_v18  ;;  %v2520_v40 = vmul.f32 %v4348_v4, %v53_v33  ;;  %v2496_v43 = vmul.f32 %v4345_v0, %v53_v33 }
 0x54d   :  { %v51_v51 = vunpack.c.l.bf16 %v3332_v50  ;;  %v52_v4 = vunpack.c.h.bf16 %v3332_v50 }
 0x54e   :  { %v4367_v1 = vadd.f32 %v2529_v62, %v2524_v57  ;;  %v4369_v2 = vadd.f32 %v2505_v63, %v2500_v58 }
 0x554   :  { %v3318_v9 = vpop.eup %3317 }
 0x555   :  { %v2426_v8 = vadd.bf16 1065369472, %v3318_v9 }
 0x557   :  { %3319 = vlog2.bf16 %v2426_v8 }
 0x559   :  { %v2314_v24 = vpop.f32.mrb[20].mxu1 }
 0x55a   :  { %v2315_v13 = vadd.f32 %v2314_v24, %v1602_v12  ;;  %v2316_v15 = vpop.f32.mrb[21].mxu1 }
 0x55b   :  { %v2317_v19 = vadd.f32 %v2316_v15, %v1606_v22  ;;  %v2318_v20 = vpop.f32.mrb[22].mxu1 }
 0x55c   :  { %v2368_v23 = vand.u32 2147483647, %v2315_v13  ;;  %v2319_v25 = vadd.f32 %v2318_v20, %v1602_v12  ;;  %v2320_v6 = vpop.f32.mrb[23].mxu1  ;;  %v2466_v54 = vmax.f32 %v2315_v13, 0.0  ;;  %v2494_v61 = vmul.f32 %v2315_v13, %v51_v51 }
 0x55d   :  { %v2369_v26 = vand.u32 2147483647, %v2317_v19  ;;  %v2321_v41 = vadd.f32 %v2320_v6, %v1606_v22  ;;  %v2467_v18 = vmax.f32 %v2317_v19, 0.0  ;;  %v2495_v5 = vmul.f32 %v2317_v19, %v52_v4  ;;  %v1355_v19 = vpop.xlane.xlu0 %1354 }
 0x55e   :  { %v2375_v7 = vand.u32 2147483647, %v2319_v25  ;;  %v2382_v21 = vsub.f32 0.0, %v2368_v23  ;;  %v2473_v55 = vmax.f32 %v2319_v25, 0.0  ;;  %v2518_v63 = vmul.f32 %v2319_v25, %v51_v51 }
 0x55f   :  { %v2376_v27 = vand.u32 2147483647, %v2321_v41  ;;  %v2383_v10 = vsub.f32 0.0, %v2369_v26  ;;  %v2474_v57 = vmax.f32 %v2321_v41, 0.0  ;;  %v2519_v9 = vmul.f32 %v2321_v41, %v52_v4 }
 0x560   :  { %v2389_v28 = vsub.f32 0.0, %v2375_v7  ;;  %v1356_v41 = vmul.f32 0.5, %v1355_v19 }
 0x561   :  { %v2390_v29 = vsub.f32 0.0, %v2376_v27 }
 0x562   :  { %v2396_v30 = vpack.c.bf16 %v2389_v28, %v2382_v21  ;;  %v3320_v31 = vpop.eup %3319 }
 0x563   :  { %v2397_v60 = vpack.c.bf16 %v2390_v29, %v2383_v10  ;;  %v2447_v34 = vmul.bf16 1060192049, %v3320_v31 }
 0x564   :  { %v2412_v11 = vmul.bf16 1069105081, %v2396_v30 }
 0x565   :  { %v2415_v36 = vmul.bf16 1069105081, %v2397_v60  ;;  %v2461_v37 = vunpack.c.h.bf16 %v2447_v34  ;;  %v2454_v39 = vunpack.c.l.bf16 %v2447_v34 }
 0x566   :  { %3321 = vpow.bf16 %v2412_v11 }
 0x567   :  { %3323 = vpow.bf16 %v2415_v36  ;;  %v2489_v16 = vadd.f32 %v2475_v38, %v2461_v37  ;;  %v2482_v42 = vadd.f32 %v2468_v14, %v2454_v39 }
 0x569   :  { %v2527_v44 = vsub.f32 %v2489_v16, %v2520_v40  ;;  %v2503_v35 = vsub.f32 %v2482_v42, %v2496_v43 }
 0x56b   :  { %v2533_v27 = vsel %vm678_vm0, %v2527_v44, 0.0  ;;  %v2509_v13 = vsel %vm678_vm0, %v2503_v35, 0.0 }
 0x571   :  { %v3322_v45 = vpop.eup %3321 }
 0x572   :  { %v3324_v46 = vpop.eup %3323  ;;  %v2424_v17 = vadd.bf16 1065369472, %v3322_v45 }
 0x573   :  { %v2425_v47 = vadd.bf16 1065369472, %v3324_v46 }
 0x574   :  { %3325 = vlog2.bf16 %v2424_v17 }
 0x575   :  { %3327 = vlog2.bf16 %v2425_v47 }
 0x57f   :  { %v3326_v48 = vpop.eup %3325 }
 0x580   :  { %v3328_v49 = vpop.eup %3327  ;;  %v2441_v52 = vmul.bf16 1060192049, %v3326_v48 }
 0x581   :  { %v2444_v53 = vmul.bf16 1060192049, %v3328_v49 }
 0x582   :  { %v2459_v0 = vunpack.c.h.bf16 %v2441_v52  ;;  %v2452_v56 = vunpack.c.l.bf16 %v2441_v52 }
 0x583   :  { %v2460_v58 = vunpack.c.h.bf16 %v2444_v53  ;;  %v2453_v59 = vunpack.c.l.bf16 %v2444_v53 }
 0x584   :  { %v2487_v62 = vadd.f32 %v2473_v55, %v2459_v0  ;;  %v2480_v3 = vadd.f32 %v2466_v54, %v2452_v56 }
 0x585   :  { %v2488_v12 = vadd.f32 %v2474_v57, %v2460_v58  ;;  %v2481_v8 = vadd.f32 %v2467_v18, %v2453_v59 }
 0x586   :  { %v2525_v22 = vsub.f32 %v2487_v62, %v2518_v63  ;;  %v2501_v24 = vsub.f32 %v2480_v3, %v2494_v61 }
 0x587   :  { %v2526_v15 = vsub.f32 %v2488_v12, %v2519_v9  ;;  %v2502_v20 = vsub.f32 %v2481_v8, %v2495_v5 }
 0x588   :  { %v2531_v23 = vadd.f32 %v4367_v1, %v2525_v22  ;;  %v2507_v6 = vadd.f32 %v4369_v2, %v2501_v24 }
 0x58a   :  { %v2532_v26 = vadd.f32 %v2531_v23, %v2526_v15  ;;  %v2508_v7 = vadd.f32 %v2507_v6, %v2502_v20 }
 0x58c   :  { %v2534_v25 = vadd.f32 %v2533_v27, %v2532_v26  ;;  %v2510_v21 = vadd.f32 %v2509_v13, %v2508_v7 }
 0x58e   :  { %2535 = vadd.xlane.f32.xlu1 %v2534_v25  ;;  %2511 = vadd.xlane.f32.xlu0 %v2510_v21 }
 0x61b   :  { %v2536_v28 = vpop.xlane.xlu1 %2535  ;;  %v2512_v10 = vpop.xlane.xlu0 %2511 }
 0x61c   :  { %v2537_v29 = vadd.f32 %v2536_v28, %v1356_v41  ;;  %v2513_v30 = vadd.f32 %v2512_v10, %v1356_v41 }
 0x61e   :  { %v2547_v31 = vadd.f32 %v2537_v29, %v2513_v30 }
 0x620   :  { %v2548_v1 = vrot.slane %v2547_v31, 4 }
 0x622   :  { %v2549_v60 = vadd.f32 %v2548_v1, %v2547_v31 }
 0x624   :  { %v2550_v2 = vrot.slane %v2549_v60, 2 }
 0x626   :  { %v2551_v11 = vadd.f32 %v2550_v2, %v2549_v60 }
 0x628   :  { %v2552_v32 = vrot.slane %v2551_v11, 1 }
 0x62a   :  { %v2553_v33 = vadd.f32 %v2552_v32, %v2551_v11 }
 0x62c   :  { %2554 = vst [vmem:[%s4404_s12] sm:$0xff] %v2553_v33 }

</bundles_post_ra>
